<compile_context>
chip_gen: v7x
topology: tpu7x:2x2x1
jax: 0.10.0
libtpu: 0.0.40
codegen_flags: <defaults>
</compile_context>

<pallas_src>
import functools

import jax
import jax.numpy as jnp
from jax.experimental import pallas as pl
from jax.experimental.pallas import tpu as pltpu


# ----------------------------------------------------------------------------
# Fused LN -> Linear (-> LN) kernel (memory_proj / text_proj / out_proj)
# ----------------------------------------------------------------------------
def _ln_linear_kernel(x_ref, g1_ref, b1_ref, w_ref, b_ref, g2_ref, b2_ref,
                      o_ref, *, eps, second_ln):
    x = x_ref[...]
    xf = x.astype(jnp.float32)                       # LN statistics in f32
    mu = jnp.mean(xf, axis=-1, keepdims=True)
    var = jnp.mean((xf - mu) ** 2, axis=-1, keepdims=True)
    y = (xf - mu) * jax.lax.rsqrt(var + eps) * g1_ref[...] + b1_ref[...]
    y = y.astype(x.dtype)                            # native dtype into the MXU
    out = jnp.dot(y, w_ref[...], preferred_element_type=jnp.float32) + b_ref[...]
    if second_ln:
        mu2 = jnp.mean(out, axis=-1, keepdims=True)
        var2 = jnp.mean((out - mu2) ** 2, axis=-1, keepdims=True)
        out = (out - mu2) * jax.lax.rsqrt(var2 + eps) * g2_ref[...] + b2_ref[...]
    o_ref[...] = out.astype(o_ref.dtype)


def ln_linear(x, g1, b1, w, b, g2=None, b2=None, *, eps=1e-5, block_rows=256):
    """LayerNorm(Din) -> Linear(Din, Dout) [-> LayerNorm(Dout)], row-tiled."""
    orig = x.shape
    din = orig[-1]
    dout = w.shape[1]
    x2 = x.reshape(-1, din)
    rows = x2.shape[0]

    second_ln = g2 is not None
    if g2 is None:                                   # unused (dead code) refs
        g2 = jnp.ones((1, dout), w.dtype)
        b2 = jnp.zeros((1, dout), w.dtype)

    tm = rows if rows <= block_rows else block_rows
    if tm != rows:
        tm = max(8, (tm // 8) * 8)                   # (8,128) sublane rule

    out = pl.pallas_call(
        functools.partial(_ln_linear_kernel, eps=eps, second_ln=second_ln),
        grid=(pl.cdiv(rows, tm),),
        in_specs=[
            pl.BlockSpec((tm, din), lambda i: (i, 0)),
            pl.BlockSpec((1, din), lambda i: (0, 0)),
            pl.BlockSpec((1, din), lambda i: (0, 0)),
            pl.BlockSpec((din, dout), lambda i: (0, 0)),
            pl.BlockSpec((1, dout), lambda i: (0, 0)),
            pl.BlockSpec((1, dout), lambda i: (0, 0)),
            pl.BlockSpec((1, dout), lambda i: (0, 0)),
        ],
        out_specs=pl.BlockSpec((tm, dout), lambda i: (i, 0)),
        out_shape=jax.ShapeDtypeStruct((rows, dout), x.dtype),
        compiler_params=pltpu.CompilerParams(dimension_semantics=("parallel",)),
    )(x2, g1, b1, w, b, g2, b2)
    return out.reshape(orig[:-1] + (dout,))


# ----------------------------------------------------------------------------
# Fully fused transformer decoder layer (one pallas_call per layer)
# ----------------------------------------------------------------------------
_LAYER_PARAM_ORDER = (
    "ln1_g", "ln1_b", "ln2_g", "ln2_b", "ln3_g", "ln3_b",
    "sa_wqkv", "sa_wo", "sa_bo",
    "ca_wq", "ca_wkv", "ca_wo", "ca_bo",
    "fc1_w", "fc1_b", "fc2_w", "fc2_b",
)


def _decoder_layer_kernel(
        x_ref, mem_ref,
        ln1_g, ln1_b, ln2_g, ln2_b, ln3_g, ln3_b,
        sa_wqkv, sa_wo, sa_bo,
        ca_wq, ca_wkv, ca_wo, ca_bo,
        fc1_w, fc1_b, fc2_w, fc2_b,
        o_ref, attn_scr,
        *, num_heads, eps):
    cdt = x_ref.dtype                       # native MXU operand dtype
    x = x_ref[0].astype(jnp.float32)        # (K, C) residual stream in f32
    mem = mem_ref[0]                        # (M, C), native dtype
    C = x.shape[-1]
    Dh = C // num_heads
    scale = Dh ** -0.5

    def layer_norm(v, g_ref, b_ref):        # v: f32 (K, C)
        mu = jnp.mean(v, axis=-1, keepdims=True)
        var = jnp.mean((v - mu) ** 2, axis=-1, keepdims=True)
        return (v - mu) * jax.lax.rsqrt(var + eps) * g_ref[...] + b_ref[...]

    def mha(q_all, k_all, v_all):
        # q_all (K, C), k_all/v_all (M, C); heads are lane slices of C.
        # Per-head outputs are assembled lane-dense into the VMEM scratch so
        # the out-projection matmul / HBM store see a full (K, C) tile.
        for h in range(num_heads):
            sl = slice(h * Dh, (h + 1) * Dh)
            qh = q_all[:, sl]
            kh = k_all[:, sl]
            vh = v_all[:, sl]
            s = jax.lax.dot_general(
                qh, kh, (((1,), (1,)), ((), ())),
                preferred_element_type=jnp.float32) * scale        # (K, M)
            s = s - jnp.max(s, axis=-1, keepdims=True)
            p = jnp.exp(s)
            p = p * pl.reciprocal(jnp.sum(p, axis=-1, keepdims=True),
                                  approx=True)
            attn_scr[:, sl] = jnp.dot(p.astype(cdt), vh,
                                      preferred_element_type=jnp.float32)
        return attn_scr[...].astype(cdt)                           # (K, C)

    # ---- self-attention: LN1 -> fused QKV (no bias) -> MHA -> proj + residual
    qn = layer_norm(x, ln1_g, ln1_b).astype(cdt)
    qkv = jnp.dot(qn, sa_wqkv[...],
                  preferred_element_type=jnp.float32).astype(cdt)   # (K, 3C)
    a = mha(qkv[:, :C], qkv[:, C:2 * C], qkv[:, 2 * C:])
    x = x + jnp.dot(a, sa_wo[...],
                    preferred_element_type=jnp.float32) + sa_bo[...]

    # ---- cross-attention: LN2 -> Q from x, fused KV (no bias) from memory
    qn = layer_norm(x, ln2_g, ln2_b).astype(cdt)
    q = jnp.dot(qn, ca_wq[...], preferred_element_type=jnp.float32).astype(cdt)
    kv = jnp.dot(mem, ca_wkv[...],
                 preferred_element_type=jnp.float32).astype(cdt)    # (M, 2C)
    a = mha(q, kv[:, :C], kv[:, C:])
    x = x + jnp.dot(a, ca_wo[...],
                    preferred_element_type=jnp.float32) + ca_bo[...]

    # ---- MLP: LN3 -> fc1 -> exact (erf) GELU -> fc2 + residual
    h = layer_norm(x, ln3_g, ln3_b).astype(cdt)
    h = jnp.dot(h, fc1_w[...], preferred_element_type=jnp.float32) + fc1_b[...]
    h = 0.5 * h * (1.0 + jax.lax.erf(h * 0.7071067811865476))
    h = jnp.dot(h.astype(cdt), fc2_w[...],
                preferred_element_type=jnp.float32) + fc2_b[...]
    x = x + h

    o_ref[0] = x.astype(o_ref.dtype)


def decoder_layer(x, mem, lp, num_heads, eps=1e-5):
    B, K, C = x.shape
    M = mem.shape[1]
    weights = [lp[name] for name in _LAYER_PARAM_ORDER]   # all 2-D arrays

    in_specs = [
        pl.BlockSpec((1, K, C), lambda b: (b, 0, 0)),     # x: one batch / step
        pl.BlockSpec((1, M, C), lambda b: (b, 0, 0)),     # memory
    ]
    in_specs += [pl.BlockSpec(w.shape, lambda b: (0, 0)) for w in weights]

    return pl.pallas_call(
        functools.partial(_decoder_layer_kernel, num_heads=num_heads, eps=eps),
        grid=(B,),
        in_specs=in_specs,
        out_specs=pl.BlockSpec((1, K, C), lambda b: (b, 0, 0)),
        out_shape=jax.ShapeDtypeStruct((B, K, C), x.dtype),
        scratch_shapes=[pltpu.VMEM((K, C), jnp.float32)],  # lane-dense head buf
        compiler_params=pltpu.CompilerParams(dimension_semantics=("parallel",)),
    )(x, mem, *weights)


# ----------------------------------------------------------------------------
# Model forward
# ----------------------------------------------------------------------------
def context_decoder_forward(text, visual, params, num_heads):
    # memory_proj: LN(visual_dim) -> Linear(visual_dim, width) -> LN(width)
    mem = ln_linear(visual, params["mem_ln1_g"], params["mem_ln1_b"],
                    params["mem_fc_w"], params["mem_fc_b"],
                    params["mem_ln2_g"], params["mem_ln2_b"])
    # text_proj: LN(visual_dim) -> Linear(visual_dim, width)
    x = ln_linear(text, params["txt_ln_g"], params["txt_ln_b"],
                  params["txt_fc_w"], params["txt_fc_b"])
    # decoder stack: one fused pallas_call per layer
    for lp in params["layers"]:
        x = decoder_layer(x, mem, lp, num_heads)
    # out_proj: LN(width) -> Linear(width, visual_dim)
    return ln_linear(x, params["out_ln_g"], params["out_ln_b"],
                     params["out_fc_w"], params["out_fc_b"])


# ----------------------------------------------------------------------------
# Deterministic parameter init (mirrors ContextDecoder._init_weights).
# Linear weights stored as (in, out); q|k|v (and cross-attn k|v) are fused
# column-wise at parameter-build time so the kernel does one QKV matmul.
# ----------------------------------------------------------------------------
def make_params(key, width, heads, layers, visual_dim, dtype=jnp.float32):
    keys = iter(jax.random.split(key, 4096))

    def trunc_normal(shape, std=0.02):
        return (jax.random.truncated_normal(next(keys), -2.0, 2.0, shape,
                                            jnp.float32) * std).astype(dtype)

    def lin(din, dout):
        return trunc_normal((din, dout)), jnp.zeros((1, dout), dtype)

    def ln(d):
        return jnp.ones((1, d), dtype), jnp.zeros((1, d), dtype)

    p = {}
    p["mem_ln1_g"], p["mem_ln1_b"] = ln(visual_dim)
    p["mem_fc_w"], p["mem_fc_b"] = lin(visual_dim, width)
    p["mem_ln2_g"], p["mem_ln2_b"] = ln(width)
    p["txt_ln_g"], p["txt_ln_b"] = ln(visual_dim)
    p["txt_fc_w"], p["txt_fc_b"] = lin(visual_dim, width)

    p["layers"] = []
    for _ in range(layers):
        lp = {}
        lp["ln1_g"], lp["ln1_b"] = ln(width)
        lp["ln2_g"], lp["ln2_b"] = ln(width)
        lp["ln3_g"], lp["ln3_b"] = ln(width)
        # self-attention: fused q|k|v weight (qkv_bias=False -> no bias at all)
        lp["sa_wqkv"] = jnp.concatenate(
            [trunc_normal((width, width)) for _ in range(3)], axis=1)
        lp["sa_wo"], lp["sa_bo"] = lin(width, width)
        # cross-attention: q weight + fused k|v weight
        lp["ca_wq"] = trunc_normal((width, width))
        lp["ca_wkv"] = jnp.concatenate(
            [trunc_normal((width, width)) for _ in range(2)], axis=1)
        lp["ca_wo"], lp["ca_bo"] = lin(width, width)
        lp["fc1_w"], lp["fc1_b"] = lin(width, width * 4)
        lp["fc2_w"], lp["fc2_b"] = lin(width * 4, width)
        p["layers"].append(lp)

    p["out_ln_g"], p["out_ln_b"] = ln(width)
    p["out_fc_w"], p["out_fc_b"] = lin(width, visual_dim)
    return p


# ----------------------------------------------------------------------------
if __name__ == "__main__":
    transformer_width = 32
    transformer_heads = 4
    transformer_layers = 2
    visual_dim = 64

    B = 2     # batch
    K = 8     # text tokens
    N = 16    # visual tokens

    key = jax.random.PRNGKey(0)
    k_text, k_vis, k_params = jax.random.split(key, 3)
    text = jax.random.normal(k_text, (B, K, visual_dim), jnp.float32)
    visual = jax.random.normal(k_vis, (B, N, visual_dim), jnp.float32)

    params = make_params(k_params, transformer_width, transformer_heads,
                         transformer_layers, visual_dim)

    fwd = jax.jit(functools.partial(context_decoder_forward,
                                    num_heads=transformer_heads))
    out = jax.block_until_ready(fwd(text, visual, params))
    assert out.shape == (B, K, visual_dim), out.shape
    print("KERNEL_OK")
</pallas_src>

<mosaic_0001>
module attributes {stable_mosaic.version = 11 : i64} {
  func.func @_ln_linear_kernel(%arg0: i32, %arg1: memref<32x64xf32, #tpu.memory_space<vmem>>, %arg2: memref<1x64xf32, #tpu.memory_space<vmem>>, %arg3: memref<1x64xf32, #tpu.memory_space<vmem>>, %arg4: memref<64x32xf32, #tpu.memory_space<vmem>>, %arg5: memref<1x32xf32, #tpu.memory_space<vmem>>, %arg6: memref<1x32xf32, #tpu.memory_space<vmem>>, %arg7: memref<1x32xf32, #tpu.memory_space<vmem>>, %arg8: memref<32x32xf32, #tpu.memory_space<vmem>>) attributes {dimension_semantics = [#tpu.dimension_semantics<parallel>], iteration_bounds = array<i64: 1>, scalar_prefetch = 0 : i64, scratch_operands = 0 : i64, tpu.core_type = #tpu.core_type<tc>, window_params = [{transform_indices = @transform_0, window_bounds = array<i64: 32, 64>}, {pipeline_mode = #tpu.pipeline_mode<synchronous>, transform_indices = @transform_1, window_bounds = array<i64: 1, 64>}, {pipeline_mode = #tpu.pipeline_mode<synchronous>, transform_indices = @transform_2, window_bounds = array<i64: 1, 64>}, {pipeline_mode = #tpu.pipeline_mode<synchronous>, transform_indices = @transform_3, window_bounds = array<i64: 64, 32>}, {pipeline_mode = #tpu.pipeline_mode<synchronous>, transform_indices = @transform_4, window_bounds = array<i64: 1, 32>}, {pipeline_mode = #tpu.pipeline_mode<synchronous>, transform_indices = @transform_5, window_bounds = array<i64: 1, 32>}, {pipeline_mode = #tpu.pipeline_mode<synchronous>, transform_indices = @transform_6, window_bounds = array<i64: 1, 32>}, {transform_indices = @transform_7, window_bounds = array<i64: 32, 32>}]} {
    %c0 = arith.constant 0 : index
    %c0_0 = arith.constant 0 : index
    %0 = vector.load %arg1[%c0, %c0_0] : memref<32x64xf32, #tpu.memory_space<vmem>>, vector<32x64xf32>
    %cst = arith.constant dense<0.000000e+00> : vector<32xf32>
    %1 = vector.multi_reduction <add>, %0, %cst [1] : vector<32x64xf32> to vector<32xf32>
    %2 = vector.shape_cast %1 : vector<32xf32> to vector<32x1xf32>
    %cst_1 = arith.constant 6.400000e+01 : f32
    %3 = vector.broadcast %cst_1 : f32 to vector<32x1xf32>
    %4 = arith.divf %2, %3 : vector<32x1xf32>
    %5 = vector.broadcast %4 : vector<32x1xf32> to vector<32x64xf32>
    %6 = arith.subf %0, %5 : vector<32x64xf32>
    %7 = arith.mulf %6, %6 : vector<32x64xf32>
    %cst_2 = arith.constant dense<0.000000e+00> : vector<32xf32>
    %8 = vector.multi_reduction <add>, %7, %cst_2 [1] : vector<32x64xf32> to vector<32xf32>
    %9 = vector.shape_cast %8 : vector<32xf32> to vector<32x1xf32>
    %cst_3 = arith.constant 6.400000e+01 : f32
    %10 = vector.broadcast %cst_3 : f32 to vector<32x1xf32>
    %11 = arith.divf %9, %10 : vector<32x1xf32>
    %12 = vector.broadcast %4 : vector<32x1xf32> to vector<32x64xf32>
    %13 = arith.subf %0, %12 : vector<32x64xf32>
    %cst_4 = arith.constant 9.99999974E-6 : f32
    %14 = vector.broadcast %cst_4 : f32 to vector<32x1xf32>
    %15 = arith.addf %11, %14 : vector<32x1xf32>
    %16 = math.rsqrt %15 : vector<32x1xf32>
    %17 = vector.broadcast %16 : vector<32x1xf32> to vector<32x64xf32>
    %18 = arith.mulf %13, %17 : vector<32x64xf32>
    %c0_5 = arith.constant 0 : index
    %c0_6 = arith.constant 0 : index
    %19 = vector.load %arg2[%c0_5, %c0_6] : memref<1x64xf32, #tpu.memory_space<vmem>>, vector<1x64xf32>
    %20 = vector.broadcast %19 : vector<1x64xf32> to vector<32x64xf32>
    %21 = arith.mulf %18, %20 : vector<32x64xf32>
    %c0_7 = arith.constant 0 : index
    %c0_8 = arith.constant 0 : index
    %22 = vector.load %arg3[%c0_7, %c0_8] : memref<1x64xf32, #tpu.memory_space<vmem>>, vector<1x64xf32>
    %23 = vector.broadcast %22 : vector<1x64xf32> to vector<32x64xf32>
    %24 = arith.addf %21, %23 : vector<32x64xf32>
    %c0_9 = arith.constant 0 : index
    %c0_10 = arith.constant 0 : index
    %25 = vector.load %arg4[%c0_9, %c0_10] : memref<64x32xf32, #tpu.memory_space<vmem>>, vector<64x32xf32>
    %cst_11 = arith.constant dense<0.000000e+00> : vector<32x32xf32>
    %26 = tpu.matmul %24, %25, %cst_11 {dimension_numbers = #tpu.dot_dimension_numbers<[1], [0], [0], [1], [0, 0, 1, 1], [], []>} : vector<32x64xf32>, vector<64x32xf32>, vector<32x32xf32> -> vector<32x32xf32>
    %c0_12 = arith.constant 0 : index
    %c0_13 = arith.constant 0 : index
    %27 = vector.load %arg5[%c0_12, %c0_13] : memref<1x32xf32, #tpu.memory_space<vmem>>, vector<1x32xf32>
    %28 = vector.broadcast %27 : vector<1x32xf32> to vector<32x32xf32>
    %29 = arith.addf %26, %28 : vector<32x32xf32>
    %cst_14 = arith.constant dense<0.000000e+00> : vector<32xf32>
    %30 = vector.multi_reduction <add>, %29, %cst_14 [1] : vector<32x32xf32> to vector<32xf32>
    %31 = vector.shape_cast %30 : vector<32xf32> to vector<32x1xf32>
    %cst_15 = arith.constant 3.200000e+01 : f32
    %32 = vector.broadcast %cst_15 : f32 to vector<32x1xf32>
    %33 = arith.divf %31, %32 : vector<32x1xf32>
    %34 = vector.broadcast %33 : vector<32x1xf32> to vector<32x32xf32>
    %35 = arith.subf %29, %34 : vector<32x32xf32>
    %36 = arith.mulf %35, %35 : vector<32x32xf32>
    %cst_16 = arith.constant dense<0.000000e+00> : vector<32xf32>
    %37 = vector.multi_reduction <add>, %36, %cst_16 [1] : vector<32x32xf32> to vector<32xf32>
    %38 = vector.shape_cast %37 : vector<32xf32> to vector<32x1xf32>
    %cst_17 = arith.constant 3.200000e+01 : f32
    %39 = vector.broadcast %cst_17 : f32 to vector<32x1xf32>
    %40 = arith.divf %38, %39 : vector<32x1xf32>
    %41 = vector.broadcast %33 : vector<32x1xf32> to vector<32x32xf32>
    %42 = arith.subf %29, %41 : vector<32x32xf32>
    %cst_18 = arith.constant 9.99999974E-6 : f32
    %43 = vector.broadcast %cst_18 : f32 to vector<32x1xf32>
    %44 = arith.addf %40, %43 : vector<32x1xf32>
    %45 = math.rsqrt %44 : vector<32x1xf32>
    %46 = vector.broadcast %45 : vector<32x1xf32> to vector<32x32xf32>
    %47 = arith.mulf %42, %46 : vector<32x32xf32>
    %c0_19 = arith.constant 0 : index
    %c0_20 = arith.constant 0 : index
    %48 = vector.load %arg6[%c0_19, %c0_20] : memref<1x32xf32, #tpu.memory_space<vmem>>, vector<1x32xf32>
    %49 = vector.broadcast %48 : vector<1x32xf32> to vector<32x32xf32>
    %50 = arith.mulf %47, %49 : vector<32x32xf32>
    %c0_21 = arith.constant 0 : index
    %c0_22 = arith.constant 0 : index
    %51 = vector.load %arg7[%c0_21, %c0_22] : memref<1x32xf32, #tpu.memory_space<vmem>>, vector<1x32xf32>
    %52 = vector.broadcast %51 : vector<1x32xf32> to vector<32x32xf32>
    %53 = arith.addf %50, %52 : vector<32x32xf32>
    %c0_23 = arith.constant 0 : index
    %c0_24 = arith.constant 0 : index
    %54 = vector.load %arg8[%c0_23, %c0_24] : memref<32x32xf32, #tpu.memory_space<vmem>>, vector<32x32xf32>
    tpu.vector_store %arg8[%c0_23, %c0_24], %53 {strides = array<i32>} : memref<32x32xf32, #tpu.memory_space<vmem>>, vector<32x32xf32>,
    return
  }
  func.func @transform_0(%arg0: i32) -> (i32, i32) {
    %c0_i32 = arith.constant 0 : i32
    %c0_i32_0 = arith.constant 0 : i32
    return %arg0, %c0_i32 : i32, i32
  }
  func.func @transform_1(%arg0: i32) -> (i32, i32) {
    %c0_i32 = arith.constant 0 : i32
    %c0_i32_0 = arith.constant 0 : i32
    %c0_i32_1 = arith.constant 0 : i32
    return %c0_i32, %c0_i32_0 : i32, i32
  }
  func.func @transform_2(%arg0: i32) -> (i32, i32) {
    %c0_i32 = arith.constant 0 : i32
    %c0_i32_0 = arith.constant 0 : i32
    %c0_i32_1 = arith.constant 0 : i32
    return %c0_i32, %c0_i32_0 : i32, i32
  }
  func.func @transform_3(%arg0: i32) -> (i32, i32) {
    %c0_i32 = arith.constant 0 : i32
    %c0_i32_0 = arith.constant 0 : i32
    %c0_i32_1 = arith.constant 0 : i32
    return %c0_i32, %c0_i32_0 : i32, i32
  }
  func.func @transform_4(%arg0: i32) -> (i32, i32) {
    %c0_i32 = arith.constant 0 : i32
    %c0_i32_0 = arith.constant 0 : i32
    %c0_i32_1 = arith.constant 0 : i32
    return %c0_i32, %c0_i32_0 : i32, i32
  }
  func.func @transform_5(%arg0: i32) -> (i32, i32) {
    %c0_i32 = arith.constant 0 : i32
    %c0_i32_0 = arith.constant 0 : i32
    %c0_i32_1 = arith.constant 0 : i32
    return %c0_i32, %c0_i32_0 : i32, i32
  }
  func.func @transform_6(%arg0: i32) -> (i32, i32) {
    %c0_i32 = arith.constant 0 : i32
    %c0_i32_0 = arith.constant 0 : i32
    %c0_i32_1 = arith.constant 0 : i32
    return %c0_i32, %c0_i32_0 : i32, i32
  }
  func.func @transform_7(%arg0: i32) -> (i32, i32) {
    %c0_i32 = arith.constant 0 : i32
    %c0_i32_0 = arith.constant 0 : i32
    return %arg0, %c0_i32 : i32, i32
  }
}

module attributes {stable_mosaic.version = 11 : i64} {
  func.func @_ln_linear_kernel(%arg0: i32, %arg1: memref<16x64xf32, #tpu.memory_space<vmem>>, %arg2: memref<1x64xf32, #tpu.memory_space<vmem>>, %arg3: memref<1x64xf32, #tpu.memory_space<vmem>>, %arg4: memref<64x32xf32, #tpu.memory_space<vmem>>, %arg5: memref<1x32xf32, #tpu.memory_space<vmem>>, %arg6: memref<1x32xf32, #tpu.memory_space<vmem>>, %arg7: memref<1x32xf32, #tpu.memory_space<vmem>>, %arg8: memref<16x32xf32, #tpu.memory_space<vmem>>) attributes {dimension_semantics = [#tpu.dimension_semantics<parallel>], iteration_bounds = array<i64: 1>, scalar_prefetch = 0 : i64, scratch_operands = 0 : i64, tpu.core_type = #tpu.core_type<tc>, window_params = [{transform_indices = @transform_0, window_bounds = array<i64: 16, 64>}, {pipeline_mode = #tpu.pipeline_mode<synchronous>, transform_indices = @transform_1, window_bounds = array<i64: 1, 64>}, {pipeline_mode = #tpu.pipeline_mode<synchronous>, transform_indices = @transform_2, window_bounds = array<i64: 1, 64>}, {pipeline_mode = #tpu.pipeline_mode<synchronous>, transform_indices = @transform_3, window_bounds = array<i64: 64, 32>}, {pipeline_mode = #tpu.pipeline_mode<synchronous>, transform_indices = @transform_4, window_bounds = array<i64: 1, 32>}, {pipeline_mode = #tpu.pipeline_mode<synchronous>, transform_indices = @transform_5, window_bounds = array<i64: 1, 32>}, {pipeline_mode = #tpu.pipeline_mode<synchronous>, transform_indices = @transform_6, window_bounds = array<i64: 1, 32>}, {transform_indices = @transform_7, window_bounds = array<i64: 16, 32>}]} {
    %c0 = arith.constant 0 : index
    %c0_0 = arith.constant 0 : index
    %0 = vector.load %arg1[%c0, %c0_0] : memref<16x64xf32, #tpu.memory_space<vmem>>, vector<16x64xf32>
    %cst = arith.constant dense<0.000000e+00> : vector<16xf32>
    %1 = vector.multi_reduction <add>, %0, %cst [1] : vector<16x64xf32> to vector<16xf32>
    %2 = vector.shape_cast %1 : vector<16xf32> to vector<16x1xf32>
    %cst_1 = arith.constant 6.400000e+01 : f32
    %3 = vector.broadcast %cst_1 : f32 to vector<16x1xf32>
    %4 = arith.divf %2, %3 : vector<16x1xf32>
    %5 = vector.broadcast %4 : vector<16x1xf32> to vector<16x64xf32>
    %6 = arith.subf %0, %5 : vector<16x64xf32>
    %7 = arith.mulf %6, %6 : vector<16x64xf32>
    %cst_2 = arith.constant dense<0.000000e+00> : vector<16xf32>
    %8 = vector.multi_reduction <add>, %7, %cst_2 [1] : vector<16x64xf32> to vector<16xf32>
    %9 = vector.shape_cast %8 : vector<16xf32> to vector<16x1xf32>
    %cst_3 = arith.constant 6.400000e+01 : f32
    %10 = vector.broadcast %cst_3 : f32 to vector<16x1xf32>
    %11 = arith.divf %9, %10 : vector<16x1xf32>
    %12 = vector.broadcast %4 : vector<16x1xf32> to vector<16x64xf32>
    %13 = arith.subf %0, %12 : vector<16x64xf32>
    %cst_4 = arith.constant 9.99999974E-6 : f32
    %14 = vector.broadcast %cst_4 : f32 to vector<16x1xf32>
    %15 = arith.addf %11, %14 : vector<16x1xf32>
    %16 = math.rsqrt %15 : vector<16x1xf32>
    %17 = vector.broadcast %16 : vector<16x1xf32> to vector<16x64xf32>
    %18 = arith.mulf %13, %17 : vector<16x64xf32>
    %c0_5 = arith.constant 0 : index
    %c0_6 = arith.constant 0 : index
    %19 = vector.load %arg2[%c0_5, %c0_6] : memref<1x64xf32, #tpu.memory_space<vmem>>, vector<1x64xf32>
    %20 = vector.broadcast %19 : vector<1x64xf32> to vector<16x64xf32>
    %21 = arith.mulf %18, %20 : vector<16x64xf32>
    %c0_7 = arith.constant 0 : index
    %c0_8 = arith.constant 0 : index
    %22 = vector.load %arg3[%c0_7, %c0_8] : memref<1x64xf32, #tpu.memory_space<vmem>>, vector<1x64xf32>
    %23 = vector.broadcast %22 : vector<1x64xf32> to vector<16x64xf32>
    %24 = arith.addf %21, %23 : vector<16x64xf32>
    %c0_9 = arith.constant 0 : index
    %c0_10 = arith.constant 0 : index
    %25 = vector.load %arg4[%c0_9, %c0_10] : memref<64x32xf32, #tpu.memory_space<vmem>>, vector<64x32xf32>
    %cst_11 = arith.constant dense<0.000000e+00> : vector<16x32xf32>
    %26 = tpu.matmul %24, %25, %cst_11 {dimension_numbers = #tpu.dot_dimension_numbers<[1], [0], [0], [1], [0, 0, 1, 1], [], []>} : vector<16x64xf32>, vector<64x32xf32>, vector<16x32xf32> -> vector<16x32xf32>
    %c0_12 = arith.constant 0 : index
    %c0_13 = arith.constant 0 : index
    %27 = vector.load %arg5[%c0_12, %c0_13] : memref<1x32xf32, #tpu.memory_space<vmem>>, vector<1x32xf32>
    %28 = vector.broadcast %27 : vector<1x32xf32> to vector<16x32xf32>
    %29 = arith.addf %26, %28 : vector<16x32xf32>
    %c0_14 = arith.constant 0 : index
    %c0_15 = arith.constant 0 : index
    %30 = vector.load %arg8[%c0_14, %c0_15] : memref<16x32xf32, #tpu.memory_space<vmem>>, vector<16x32xf32>
    tpu.vector_store %arg8[%c0_14, %c0_15], %29 {strides = array<i32>} : memref<16x32xf32, #tpu.memory_space<vmem>>, vector<16x32xf32>,
    return
  }
  func.func @transform_0(%arg0: i32) -> (i32, i32) {
    %c0_i32 = arith.constant 0 : i32
    %c0_i32_0 = arith.constant 0 : i32
    return %arg0, %c0_i32 : i32, i32
  }
  func.func @transform_1(%arg0: i32) -> (i32, i32) {
    %c0_i32 = arith.constant 0 : i32
    %c0_i32_0 = arith.constant 0 : i32
    %c0_i32_1 = arith.constant 0 : i32
    return %c0_i32, %c0_i32_0 : i32, i32
  }
  func.func @transform_2(%arg0: i32) -> (i32, i32) {
    %c0_i32 = arith.constant 0 : i32
    %c0_i32_0 = arith.constant 0 : i32
    %c0_i32_1 = arith.constant 0 : i32
    return %c0_i32, %c0_i32_0 : i32, i32
  }
  func.func @transform_3(%arg0: i32) -> (i32, i32) {
    %c0_i32 = arith.constant 0 : i32
    %c0_i32_0 = arith.constant 0 : i32
    %c0_i32_1 = arith.constant 0 : i32
    return %c0_i32, %c0_i32_0 : i32, i32
  }
  func.func @transform_4(%arg0: i32) -> (i32, i32) {
    %c0_i32 = arith.constant 0 : i32
    %c0_i32_0 = arith.constant 0 : i32
    %c0_i32_1 = arith.constant 0 : i32
    return %c0_i32, %c0_i32_0 : i32, i32
  }
  func.func @transform_5(%arg0: i32) -> (i32, i32) {
    %c0_i32 = arith.constant 0 : i32
    %c0_i32_0 = arith.constant 0 : i32
    %c0_i32_1 = arith.constant 0 : i32
    return %c0_i32, %c0_i32_0 : i32, i32
  }
  func.func @transform_6(%arg0: i32) -> (i32, i32) {
    %c0_i32 = arith.constant 0 : i32
    %c0_i32_0 = arith.constant 0 : i32
    %c0_i32_1 = arith.constant 0 : i32
    return %c0_i32, %c0_i32_0 : i32, i32
  }
  func.func @transform_7(%arg0: i32) -> (i32, i32) {
    %c0_i32 = arith.constant 0 : i32
    %c0_i32_0 = arith.constant 0 : i32
    return %arg0, %c0_i32 : i32, i32
  }
}

module attributes {stable_mosaic.version = 11 : i64} {
  func.func @_decoder_layer_kernel(%arg0: i32, %arg1: memref<1x8x32xf32, #tpu.memory_space<vmem>>, %arg2: memref<1x16x32xf32, #tpu.memory_space<vmem>>, %arg3: memref<1x32xf32, #tpu.memory_space<vmem>>, %arg4: memref<1x32xf32, #tpu.memory_space<vmem>>, %arg5: memref<1x32xf32, #tpu.memory_space<vmem>>, %arg6: memref<1x32xf32, #tpu.memory_space<vmem>>, %arg7: memref<1x32xf32, #tpu.memory_space<vmem>>, %arg8: memref<1x32xf32, #tpu.memory_space<vmem>>, %arg9: memref<32x96xf32, #tpu.memory_space<vmem>>, %arg10: memref<32x32xf32, #tpu.memory_space<vmem>>, %arg11: memref<1x32xf32, #tpu.memory_space<vmem>>, %arg12: memref<32x32xf32, #tpu.memory_space<vmem>>, %arg13: memref<32x64xf32, #tpu.memory_space<vmem>>, %arg14: memref<32x32xf32, #tpu.memory_space<vmem>>, %arg15: memref<1x32xf32, #tpu.memory_space<vmem>>, %arg16: memref<32x128xf32, #tpu.memory_space<vmem>>, %arg17: memref<1x128xf32, #tpu.memory_space<vmem>>, %arg18: memref<128x32xf32, #tpu.memory_space<vmem>>, %arg19: memref<1x32xf32, #tpu.memory_space<vmem>>, %arg20: memref<1x8x32xf32, #tpu.memory_space<vmem>>, %arg21: memref<8x32xf32, #tpu.memory_space<vmem>>) attributes {dimension_semantics = [#tpu.dimension_semantics<parallel>], iteration_bounds = array<i64: 2>, scalar_prefetch = 0 : i64, scratch_operands = 1 : i64, tpu.core_type = #tpu.core_type<tc>, window_params = [{transform_indices = @transform_0, window_bounds = array<i64: 1, 8, 32>}, {transform_indices = @transform_1, window_bounds = array<i64: 1, 16, 32>}, {pipeline_mode = #tpu.pipeline_mode<synchronous>, transform_indices = @transform_2, window_bounds = array<i64: 1, 32>}, {pipeline_mode = #tpu.pipeline_mode<synchronous>, transform_indices = @transform_3, window_bounds = array<i64: 1, 32>}, {pipeline_mode = #tpu.pipeline_mode<synchronous>, transform_indices = @transform_4, window_bounds = array<i64: 1, 32>}, {pipeline_mode = #tpu.pipeline_mode<synchronous>, transform_indices = @transform_5, window_bounds = array<i64: 1, 32>}, {pipeline_mode = #tpu.pipeline_mode<synchronous>, transform_indices = @transform_6, window_bounds = array<i64: 1, 32>}, {pipeline_mode = #tpu.pipeline_mode<synchronous>, transform_indices = @transform_7, window_bounds = array<i64: 1, 32>}, {pipeline_mode = #tpu.pipeline_mode<synchronous>, transform_indices = @transform_8, window_bounds = array<i64: 32, 96>}, {pipeline_mode = #tpu.pipeline_mode<synchronous>, transform_indices = @transform_9, window_bounds = array<i64: 32, 32>}, {pipeline_mode = #tpu.pipeline_mode<synchronous>, transform_indices = @transform_10, window_bounds = array<i64: 1, 32>}, {pipeline_mode = #tpu.pipeline_mode<synchronous>, transform_indices = @transform_11, window_bounds = array<i64: 32, 32>}, {pipeline_mode = #tpu.pipeline_mode<synchronous>, transform_indices = @transform_12, window_bounds = array<i64: 32, 64>}, {pipeline_mode = #tpu.pipeline_mode<synchronous>, transform_indices = @transform_13, window_bounds = array<i64: 32, 32>}, {pipeline_mode = #tpu.pipeline_mode<synchronous>, transform_indices = @transform_14, window_bounds = array<i64: 1, 32>}, {pipeline_mode = #tpu.pipeline_mode<synchronous>, transform_indices = @transform_15, window_bounds = array<i64: 32, 128>}, {pipeline_mode = #tpu.pipeline_mode<synchronous>, transform_indices = @transform_16, window_bounds = array<i64: 1, 128>}, {pipeline_mode = #tpu.pipeline_mode<synchronous>, transform_indices = @transform_17, window_bounds = array<i64: 128, 32>}, {pipeline_mode = #tpu.pipeline_mode<synchronous>, transform_indices = @transform_18, window_bounds = array<i64: 1, 32>}, {transform_indices = @transform_19, window_bounds = array<i64: 1, 8, 32>}]} {
    %c0 = arith.constant 0 : index
    %c0_0 = arith.constant 0 : index
    %c0_1 = arith.constant 0 : index
    %0 = vector.load %arg1[%c0, %c0_0, %c0_1] : memref<1x8x32xf32, #tpu.memory_space<vmem>>, vector<1x8x32xf32>
    %1 = vector.shape_cast %0 : vector<1x8x32xf32> to vector<8x32xf32>
    %c0_2 = arith.constant 0 : index
    %c0_3 = arith.constant 0 : index
    %c0_4 = arith.constant 0 : index
    %2 = vector.load %arg2[%c0_2, %c0_3, %c0_4] : memref<1x16x32xf32, #tpu.memory_space<vmem>>, vector<1x16x32xf32>
    %3 = vector.shape_cast %2 : vector<1x16x32xf32> to vector<16x32xf32>
    %cst = arith.constant dense<0.000000e+00> : vector<8xf32>
    %4 = vector.multi_reduction <add>, %1, %cst [1] : vector<8x32xf32> to vector<8xf32>
    %5 = vector.shape_cast %4 : vector<8xf32> to vector<8x1xf32>
    %cst_5 = arith.constant 3.200000e+01 : f32
    %6 = vector.broadcast %cst_5 : f32 to vector<8x1xf32>
    %7 = arith.divf %5, %6 : vector<8x1xf32>
    %8 = vector.broadcast %7 : vector<8x1xf32> to vector<8x32xf32>
    %9 = arith.subf %1, %8 : vector<8x32xf32>
    %10 = arith.mulf %9, %9 : vector<8x32xf32>
    %cst_6 = arith.constant dense<0.000000e+00> : vector<8xf32>
    %11 = vector.multi_reduction <add>, %10, %cst_6 [1] : vector<8x32xf32> to vector<8xf32>
    %12 = vector.shape_cast %11 : vector<8xf32> to vector<8x1xf32>
    %cst_7 = arith.constant 3.200000e+01 : f32
    %13 = vector.broadcast %cst_7 : f32 to vector<8x1xf32>
    %14 = arith.divf %12, %13 : vector<8x1xf32>
    %15 = vector.broadcast %7 : vector<8x1xf32> to vector<8x32xf32>
    %16 = arith.subf %1, %15 : vector<8x32xf32>
    %cst_8 = arith.constant 9.99999974E-6 : f32
    %17 = vector.broadcast %cst_8 : f32 to vector<8x1xf32>
    %18 = arith.addf %14, %17 : vector<8x1xf32>
    %19 = math.rsqrt %18 : vector<8x1xf32>
    %20 = vector.broadcast %19 : vector<8x1xf32> to vector<8x32xf32>
    %21 = arith.mulf %16, %20 : vector<8x32xf32>
    %c0_9 = arith.constant 0 : index
    %c0_10 = arith.constant 0 : index
    %22 = vector.load %arg3[%c0_9, %c0_10] : memref<1x32xf32, #tpu.memory_space<vmem>>, vector<1x32xf32>
    %23 = vector.broadcast %22 : vector<1x32xf32> to vector<8x32xf32>
    %24 = arith.mulf %21, %23 : vector<8x32xf32>
    %c0_11 = arith.constant 0 : index
    %c0_12 = arith.constant 0 : index
    %25 = vector.load %arg4[%c0_11, %c0_12] : memref<1x32xf32, #tpu.memory_space<vmem>>, vector<1x32xf32>
    %26 = vector.broadcast %25 : vector<1x32xf32> to vector<8x32xf32>
    %27 = arith.addf %24, %26 : vector<8x32xf32>
    %c0_13 = arith.constant 0 : index
    %c0_14 = arith.constant 0 : index
    %28 = vector.load %arg9[%c0_13, %c0_14] : memref<32x96xf32, #tpu.memory_space<vmem>>, vector<32x96xf32>
    %cst_15 = arith.constant dense<0.000000e+00> : vector<8x96xf32>
    %29 = tpu.matmul %27, %28, %cst_15 {dimension_numbers = #tpu.dot_dimension_numbers<[1], [0], [0], [1], [0, 0, 1, 1], [], []>} : vector<8x32xf32>, vector<32x96xf32>, vector<8x96xf32> -> vector<8x96xf32>
    %30 = vector.extract_strided_slice %29 {offsets = [0, 0], sizes = [8, 32], strides = [1, 1]} : vector<8x96xf32> to vector<8x32xf32>
    %31 = vector.extract_strided_slice %29 {offsets = [0, 32], sizes = [8, 32], strides = [1, 1]} : vector<8x96xf32> to vector<8x32xf32>
    %32 = vector.extract_strided_slice %29 {offsets = [0, 64], sizes = [8, 32], strides = [1, 1]} : vector<8x96xf32> to vector<8x32xf32>
    %33 = vector.extract_strided_slice %30 {offsets = [0, 0], sizes = [8, 8], strides = [1, 1]} : vector<8x32xf32> to vector<8x8xf32>
    %34 = vector.extract_strided_slice %31 {offsets = [0, 0], sizes = [8, 8], strides = [1, 1]} : vector<8x32xf32> to vector<8x8xf32>
    %35 = vector.extract_strided_slice %32 {offsets = [0, 0], sizes = [8, 8], strides = [1, 1]} : vector<8x32xf32> to vector<8x8xf32>
    %cst_16 = arith.constant dense<0.000000e+00> : vector<8x8xf32>
    %36 = tpu.matmul %33, %34, %cst_16 {dimension_numbers = #tpu.dot_dimension_numbers<[1], [1], [0], [0], [0, 0, 1, 0], [], []>} : vector<8x8xf32>, vector<8x8xf32>, vector<8x8xf32> -> vector<8x8xf32>
    %cst_17 = arith.constant 0.353553385 : f32
    %37 = vector.broadcast %cst_17 : f32 to vector<8x8xf32>
    %38 = arith.mulf %36, %37 : vector<8x8xf32>
    %cst_18 = arith.constant dense<0xFF800000> : vector<8xf32>
    %39 = vector.multi_reduction <maximumf>, %38, %cst_18 [1] : vector<8x8xf32> to vector<8xf32>
    %40 = vector.shape_cast %39 : vector<8xf32> to vector<8x1xf32>
    %41 = vector.broadcast %40 : vector<8x1xf32> to vector<8x8xf32>
    %42 = arith.subf %38, %41 : vector<8x8xf32>
    %43 = math.exp %42 : vector<8x8xf32>
    %cst_19 = arith.constant dense<0.000000e+00> : vector<8xf32>
    %44 = vector.multi_reduction <add>, %43, %cst_19 [1] : vector<8x8xf32> to vector<8xf32>
    %45 = vector.shape_cast %44 : vector<8xf32> to vector<8x1xf32>
    %46 = tpu.reciprocal %45 {approx = true} : vector<8x1xf32> -> vector<8x1xf32>
    %47 = vector.broadcast %46 : vector<8x1xf32> to vector<8x8xf32>
    %48 = arith.mulf %43, %47 : vector<8x8xf32>
    %cst_20 = arith.constant dense<0.000000e+00> : vector<8x8xf32>
    %49 = tpu.matmul %48, %35, %cst_20 {dimension_numbers = #tpu.dot_dimension_numbers<[1], [0], [0], [1], [0, 0, 1, 1], [], []>} : vector<8x8xf32>, vector<8x8xf32>, vector<8x8xf32> -> vector<8x8xf32>
    %c0_21 = arith.constant 0 : index
    %c0_22 = arith.constant 0 : index
    %50 = vector.load %arg21[%c0_21, %c0_22] : memref<8x32xf32, #tpu.memory_space<vmem>>, vector<8x8xf32>
    tpu.vector_store %arg21[%c0_21, %c0_22], %49 {strides = array<i32>} : memref<8x32xf32, #tpu.memory_space<vmem>>, vector<8x8xf32>,
    %51 = vector.extract_strided_slice %30 {offsets = [0, 8], sizes = [8, 8], strides = [1, 1]} : vector<8x32xf32> to vector<8x8xf32>
    %52 = vector.extract_strided_slice %31 {offsets = [0, 8], sizes = [8, 8], strides = [1, 1]} : vector<8x32xf32> to vector<8x8xf32>
    %53 = vector.extract_strided_slice %32 {offsets = [0, 8], sizes = [8, 8], strides = [1, 1]} : vector<8x32xf32> to vector<8x8xf32>
    %cst_23 = arith.constant dense<0.000000e+00> : vector<8x8xf32>
    %54 = tpu.matmul %51, %52, %cst_23 {dimension_numbers = #tpu.dot_dimension_numbers<[1], [1], [0], [0], [0, 0, 1, 0], [], []>} : vector<8x8xf32>, vector<8x8xf32>, vector<8x8xf32> -> vector<8x8xf32>
    %cst_24 = arith.constant 0.353553385 : f32
    %55 = vector.broadcast %cst_24 : f32 to vector<8x8xf32>
    %56 = arith.mulf %54, %55 : vector<8x8xf32>
    %cst_25 = arith.constant dense<0xFF800000> : vector<8xf32>
    %57 = vector.multi_reduction <maximumf>, %56, %cst_25 [1] : vector<8x8xf32> to vector<8xf32>
    %58 = vector.shape_cast %57 : vector<8xf32> to vector<8x1xf32>
    %59 = vector.broadcast %58 : vector<8x1xf32> to vector<8x8xf32>
    %60 = arith.subf %56, %59 : vector<8x8xf32>
    %61 = math.exp %60 : vector<8x8xf32>
    %cst_26 = arith.constant dense<0.000000e+00> : vector<8xf32>
    %62 = vector.multi_reduction <add>, %61, %cst_26 [1] : vector<8x8xf32> to vector<8xf32>
    %63 = vector.shape_cast %62 : vector<8xf32> to vector<8x1xf32>
    %64 = tpu.reciprocal %63 {approx = true} : vector<8x1xf32> -> vector<8x1xf32>
    %65 = vector.broadcast %64 : vector<8x1xf32> to vector<8x8xf32>
    %66 = arith.mulf %61, %65 : vector<8x8xf32>
    %cst_27 = arith.constant dense<0.000000e+00> : vector<8x8xf32>
    %67 = tpu.matmul %66, %53, %cst_27 {dimension_numbers = #tpu.dot_dimension_numbers<[1], [0], [0], [1], [0, 0, 1, 1], [], []>} : vector<8x8xf32>, vector<8x8xf32>, vector<8x8xf32> -> vector<8x8xf32>
    %c0_28 = arith.constant 0 : index
    %c8 = arith.constant 8 : index
    %68 = vector.load %arg21[%c0_28, %c8] : memref<8x32xf32, #tpu.memory_space<vmem>>, vector<8x8xf32>
    tpu.vector_store %arg21[%c0_28, %c8], %67 {strides = array<i32>} : memref<8x32xf32, #tpu.memory_space<vmem>>, vector<8x8xf32>,
    %69 = vector.extract_strided_slice %30 {offsets = [0, 16], sizes = [8, 8], strides = [1, 1]} : vector<8x32xf32> to vector<8x8xf32>
    %70 = vector.extract_strided_slice %31 {offsets = [0, 16], sizes = [8, 8], strides = [1, 1]} : vector<8x32xf32> to vector<8x8xf32>
    %71 = vector.extract_strided_slice %32 {offsets = [0, 16], sizes = [8, 8], strides = [1, 1]} : vector<8x32xf32> to vector<8x8xf32>
    %cst_29 = arith.constant dense<0.000000e+00> : vector<8x8xf32>
    %72 = tpu.matmul %69, %70, %cst_29 {dimension_numbers = #tpu.dot_dimension_numbers<[1], [1], [0], [0], [0, 0, 1, 0], [], []>} : vector<8x8xf32>, vector<8x8xf32>, vector<8x8xf32> -> vector<8x8xf32>
    %cst_30 = arith.constant 0.353553385 : f32
    %73 = vector.broadcast %cst_30 : f32 to vector<8x8xf32>
    %74 = arith.mulf %72, %73 : vector<8x8xf32>
    %cst_31 = arith.constant dense<0xFF800000> : vector<8xf32>
    %75 = vector.multi_reduction <maximumf>, %74, %cst_31 [1] : vector<8x8xf32> to vector<8xf32>
    %76 = vector.shape_cast %75 : vector<8xf32> to vector<8x1xf32>
    %77 = vector.broadcast %76 : vector<8x1xf32> to vector<8x8xf32>
    %78 = arith.subf %74, %77 : vector<8x8xf32>
    %79 = math.exp %78 : vector<8x8xf32>
    %cst_32 = arith.constant dense<0.000000e+00> : vector<8xf32>
    %80 = vector.multi_reduction <add>, %79, %cst_32 [1] : vector<8x8xf32> to vector<8xf32>
    %81 = vector.shape_cast %80 : vector<8xf32> to vector<8x1xf32>
    %82 = tpu.reciprocal %81 {approx = true} : vector<8x1xf32> -> vector<8x1xf32>
    %83 = vector.broadcast %82 : vector<8x1xf32> to vector<8x8xf32>
    %84 = arith.mulf %79, %83 : vector<8x8xf32>
    %cst_33 = arith.constant dense<0.000000e+00> : vector<8x8xf32>
    %85 = tpu.matmul %84, %71, %cst_33 {dimension_numbers = #tpu.dot_dimension_numbers<[1], [0], [0], [1], [0, 0, 1, 1], [], []>} : vector<8x8xf32>, vector<8x8xf32>, vector<8x8xf32> -> vector<8x8xf32>
    %c0_34 = arith.constant 0 : index
    %c16 = arith.constant 16 : index
    %86 = vector.load %arg21[%c0_34, %c16] : memref<8x32xf32, #tpu.memory_space<vmem>>, vector<8x8xf32>
    tpu.vector_store %arg21[%c0_34, %c16], %85 {strides = array<i32>} : memref<8x32xf32, #tpu.memory_space<vmem>>, vector<8x8xf32>,
    %87 = vector.extract_strided_slice %30 {offsets = [0, 24], sizes = [8, 8], strides = [1, 1]} : vector<8x32xf32> to vector<8x8xf32>
    %88 = vector.extract_strided_slice %31 {offsets = [0, 24], sizes = [8, 8], strides = [1, 1]} : vector<8x32xf32> to vector<8x8xf32>
    %89 = vector.extract_strided_slice %32 {offsets = [0, 24], sizes = [8, 8], strides = [1, 1]} : vector<8x32xf32> to vector<8x8xf32>
    %cst_35 = arith.constant dense<0.000000e+00> : vector<8x8xf32>
    %90 = tpu.matmul %87, %88, %cst_35 {dimension_numbers = #tpu.dot_dimension_numbers<[1], [1], [0], [0], [0, 0, 1, 0], [], []>} : vector<8x8xf32>, vector<8x8xf32>, vector<8x8xf32> -> vector<8x8xf32>
    %cst_36 = arith.constant 0.353553385 : f32
    %91 = vector.broadcast %cst_36 : f32 to vector<8x8xf32>
    %92 = arith.mulf %90, %91 : vector<8x8xf32>
    %cst_37 = arith.constant dense<0xFF800000> : vector<8xf32>
    %93 = vector.multi_reduction <maximumf>, %92, %cst_37 [1] : vector<8x8xf32> to vector<8xf32>
    %94 = vector.shape_cast %93 : vector<8xf32> to vector<8x1xf32>
    %95 = vector.broadcast %94 : vector<8x1xf32> to vector<8x8xf32>
    %96 = arith.subf %92, %95 : vector<8x8xf32>
    %97 = math.exp %96 : vector<8x8xf32>
    %cst_38 = arith.constant dense<0.000000e+00> : vector<8xf32>
    %98 = vector.multi_reduction <add>, %97, %cst_38 [1] : vector<8x8xf32> to vector<8xf32>
    %99 = vector.shape_cast %98 : vector<8xf32> to vector<8x1xf32>
    %100 = tpu.reciprocal %99 {approx = true} : vector<8x1xf32> -> vector<8x1xf32>
    %101 = vector.broadcast %100 : vector<8x1xf32> to vector<8x8xf32>
    %102 = arith.mulf %97, %101 : vector<8x8xf32>
    %cst_39 = arith.constant dense<0.000000e+00> : vector<8x8xf32>
    %103 = tpu.matmul %102, %89, %cst_39 {dimension_numbers = #tpu.dot_dimension_numbers<[1], [0], [0], [1], [0, 0, 1, 1], [], []>} : vector<8x8xf32>, vector<8x8xf32>, vector<8x8xf32> -> vector<8x8xf32>
    %c0_40 = arith.constant 0 : index
    %c24 = arith.constant 24 : index
    %104 = vector.load %arg21[%c0_40, %c24] : memref<8x32xf32, #tpu.memory_space<vmem>>, vector<8x8xf32>
    tpu.vector_store %arg21[%c0_40, %c24], %103 {strides = array<i32>} : memref<8x32xf32, #tpu.memory_space<vmem>>, vector<8x8xf32>,
    %c0_41 = arith.constant 0 : index
    %c0_42 = arith.constant 0 : index
    %105 = vector.load %arg21[%c0_41, %c0_42] : memref<8x32xf32, #tpu.memory_space<vmem>>, vector<8x32xf32>
    %c0_43 = arith.constant 0 : index
    %c0_44 = arith.constant 0 : index
    %106 = vector.load %arg10[%c0_43, %c0_44] : memref<32x32xf32, #tpu.memory_space<vmem>>, vector<32x32xf32>
    %cst_45 = arith.constant dense<0.000000e+00> : vector<8x32xf32>
    %107 = tpu.matmul %105, %106, %cst_45 {dimension_numbers = #tpu.dot_dimension_numbers<[1], [0], [0], [1], [0, 0, 1, 1], [], []>} : vector<8x32xf32>, vector<32x32xf32>, vector<8x32xf32> -> vector<8x32xf32>
    %108 = arith.addf %1, %107 : vector<8x32xf32>
    %c0_46 = arith.constant 0 : index
    %c0_47 = arith.constant 0 : index
    %109 = vector.load %arg11[%c0_46, %c0_47] : memref<1x32xf32, #tpu.memory_space<vmem>>, vector<1x32xf32>
    %110 = vector.broadcast %109 : vector<1x32xf32> to vector<8x32xf32>
    %111 = arith.addf %108, %110 : vector<8x32xf32>
    %cst_48 = arith.constant dense<0.000000e+00> : vector<8xf32>
    %112 = vector.multi_reduction <add>, %111, %cst_48 [1] : vector<8x32xf32> to vector<8xf32>
    %113 = vector.shape_cast %112 : vector<8xf32> to vector<8x1xf32>
    %cst_49 = arith.constant 3.200000e+01 : f32
    %114 = vector.broadcast %cst_49 : f32 to vector<8x1xf32>
    %115 = arith.divf %113, %114 : vector<8x1xf32>
    %116 = vector.broadcast %115 : vector<8x1xf32> to vector<8x32xf32>
    %117 = arith.subf %111, %116 : vector<8x32xf32>
    %118 = arith.mulf %117, %117 : vector<8x32xf32>
    %cst_50 = arith.constant dense<0.000000e+00> : vector<8xf32>
    %119 = vector.multi_reduction <add>, %118, %cst_50 [1] : vector<8x32xf32> to vector<8xf32>
    %120 = vector.shape_cast %119 : vector<8xf32> to vector<8x1xf32>
    %cst_51 = arith.constant 3.200000e+01 : f32
    %121 = vector.broadcast %cst_51 : f32 to vector<8x1xf32>
    %122 = arith.divf %120, %121 : vector<8x1xf32>
    %123 = vector.broadcast %115 : vector<8x1xf32> to vector<8x32xf32>
    %124 = arith.subf %111, %123 : vector<8x32xf32>
    %cst_52 = arith.constant 9.99999974E-6 : f32
    %125 = vector.broadcast %cst_52 : f32 to vector<8x1xf32>
    %126 = arith.addf %122, %125 : vector<8x1xf32>
    %127 = math.rsqrt %126 : vector<8x1xf32>
    %128 = vector.broadcast %127 : vector<8x1xf32> to vector<8x32xf32>
    %129 = arith.mulf %124, %128 : vector<8x32xf32>
    %c0_53 = arith.constant 0 : index
    %c0_54 = arith.constant 0 : index
    %130 = vector.load %arg5[%c0_53, %c0_54] : memref<1x32xf32, #tpu.memory_space<vmem>>, vector<1x32xf32>
    %131 = vector.broadcast %130 : vector<1x32xf32> to vector<8x32xf32>
    %132 = arith.mulf %129, %131 : vector<8x32xf32>
    %c0_55 = arith.constant 0 : index
    %c0_56 = arith.constant 0 : index
    %133 = vector.load %arg6[%c0_55, %c0_56] : memref<1x32xf32, #tpu.memory_space<vmem>>, vector<1x32xf32>
    %134 = vector.broadcast %133 : vector<1x32xf32> to vector<8x32xf32>
    %135 = arith.addf %132, %134 : vector<8x32xf32>
    %c0_57 = arith.constant 0 : index
    %c0_58 = arith.constant 0 : index
    %136 = vector.load %arg12[%c0_57, %c0_58] : memref<32x32xf32, #tpu.memory_space<vmem>>, vector<32x32xf32>
    %cst_59 = arith.constant dense<0.000000e+00> : vector<8x32xf32>
    %137 = tpu.matmul %135, %136, %cst_59 {dimension_numbers = #tpu.dot_dimension_numbers<[1], [0], [0], [1], [0, 0, 1, 1], [], []>} : vector<8x32xf32>, vector<32x32xf32>, vector<8x32xf32> -> vector<8x32xf32>
    %c0_60 = arith.constant 0 : index
    %c0_61 = arith.constant 0 : index
    %138 = vector.load %arg13[%c0_60, %c0_61] : memref<32x64xf32, #tpu.memory_space<vmem>>, vector<32x64xf32>
    %cst_62 = arith.constant dense<0.000000e+00> : vector<16x64xf32>
    %139 = tpu.matmul %3, %138, %cst_62 {dimension_numbers = #tpu.dot_dimension_numbers<[1], [0], [0], [1], [0, 0, 1, 1], [], []>} : vector<16x32xf32>, vector<32x64xf32>, vector<16x64xf32> -> vector<16x64xf32>
    %140 = vector.extract_strided_slice %139 {offsets = [0, 0], sizes = [16, 32], strides = [1, 1]} : vector<16x64xf32> to vector<16x32xf32>
    %141 = vector.extract_strided_slice %139 {offsets = [0, 32], sizes = [16, 32], strides = [1, 1]} : vector<16x64xf32> to vector<16x32xf32>
    %142 = vector.extract_strided_slice %137 {offsets = [0, 0], sizes = [8, 8], strides = [1, 1]} : vector<8x32xf32> to vector<8x8xf32>
    %143 = vector.extract_strided_slice %140 {offsets = [0, 0], sizes = [16, 8], strides = [1, 1]} : vector<16x32xf32> to vector<16x8xf32>
    %144 = vector.extract_strided_slice %141 {offsets = [0, 0], sizes = [16, 8], strides = [1, 1]} : vector<16x32xf32> to vector<16x8xf32>
    %cst_63 = arith.constant dense<0.000000e+00> : vector<8x16xf32>
    %145 = tpu.matmul %142, %143, %cst_63 {dimension_numbers = #tpu.dot_dimension_numbers<[1], [1], [0], [0], [0, 0, 1, 0], [], []>} : vector<8x8xf32>, vector<16x8xf32>, vector<8x16xf32> -> vector<8x16xf32>
    %cst_64 = arith.constant 0.353553385 : f32
    %146 = vector.broadcast %cst_64 : f32 to vector<8x16xf32>
    %147 = arith.mulf %145, %146 : vector<8x16xf32>
    %cst_65 = arith.constant dense<0xFF800000> : vector<8xf32>
    %148 = vector.multi_reduction <maximumf>, %147, %cst_65 [1] : vector<8x16xf32> to vector<8xf32>
    %149 = vector.shape_cast %148 : vector<8xf32> to vector<8x1xf32>
    %150 = vector.broadcast %149 : vector<8x1xf32> to vector<8x16xf32>
    %151 = arith.subf %147, %150 : vector<8x16xf32>
    %152 = math.exp %151 : vector<8x16xf32>
    %cst_66 = arith.constant dense<0.000000e+00> : vector<8xf32>
    %153 = vector.multi_reduction <add>, %152, %cst_66 [1] : vector<8x16xf32> to vector<8xf32>
    %154 = vector.shape_cast %153 : vector<8xf32> to vector<8x1xf32>
    %155 = tpu.reciprocal %154 {approx = true} : vector<8x1xf32> -> vector<8x1xf32>
    %156 = vector.broadcast %155 : vector<8x1xf32> to vector<8x16xf32>
    %157 = arith.mulf %152, %156 : vector<8x16xf32>
    %cst_67 = arith.constant dense<0.000000e+00> : vector<8x8xf32>
    %158 = tpu.matmul %157, %144, %cst_67 {dimension_numbers = #tpu.dot_dimension_numbers<[1], [0], [0], [1], [0, 0, 1, 1], [], []>} : vector<8x16xf32>, vector<16x8xf32>, vector<8x8xf32> -> vector<8x8xf32>
    %c0_68 = arith.constant 0 : index
    %c0_69 = arith.constant 0 : index
    %159 = vector.load %arg21[%c0_68, %c0_69] : memref<8x32xf32, #tpu.memory_space<vmem>>, vector<8x8xf32>
    tpu.vector_store %arg21[%c0_68, %c0_69], %158 {strides = array<i32>} : memref<8x32xf32, #tpu.memory_space<vmem>>, vector<8x8xf32>,
    %160 = vector.extract_strided_slice %137 {offsets = [0, 8], sizes = [8, 8], strides = [1, 1]} : vector<8x32xf32> to vector<8x8xf32>
    %161 = vector.extract_strided_slice %140 {offsets = [0, 8], sizes = [16, 8], strides = [1, 1]} : vector<16x32xf32> to vector<16x8xf32>
    %162 = vector.extract_strided_slice %141 {offsets = [0, 8], sizes = [16, 8], strides = [1, 1]} : vector<16x32xf32> to vector<16x8xf32>
    %cst_70 = arith.constant dense<0.000000e+00> : vector<8x16xf32>
    %163 = tpu.matmul %160, %161, %cst_70 {dimension_numbers = #tpu.dot_dimension_numbers<[1], [1], [0], [0], [0, 0, 1, 0], [], []>} : vector<8x8xf32>, vector<16x8xf32>, vector<8x16xf32> -> vector<8x16xf32>
    %cst_71 = arith.constant 0.353553385 : f32
    %164 = vector.broadcast %cst_71 : f32 to vector<8x16xf32>
    %165 = arith.mulf %163, %164 : vector<8x16xf32>
    %cst_72 = arith.constant dense<0xFF800000> : vector<8xf32>
    %166 = vector.multi_reduction <maximumf>, %165, %cst_72 [1] : vector<8x16xf32> to vector<8xf32>
    %167 = vector.shape_cast %166 : vector<8xf32> to vector<8x1xf32>
    %168 = vector.broadcast %167 : vector<8x1xf32> to vector<8x16xf32>
    %169 = arith.subf %165, %168 : vector<8x16xf32>
    %170 = math.exp %169 : vector<8x16xf32>
    %cst_73 = arith.constant dense<0.000000e+00> : vector<8xf32>
    %171 = vector.multi_reduction <add>, %170, %cst_73 [1] : vector<8x16xf32> to vector<8xf32>
    %172 = vector.shape_cast %171 : vector<8xf32> to vector<8x1xf32>
    %173 = tpu.reciprocal %172 {approx = true} : vector<8x1xf32> -> vector<8x1xf32>
    %174 = vector.broadcast %173 : vector<8x1xf32> to vector<8x16xf32>
    %175 = arith.mulf %170, %174 : vector<8x16xf32>
    %cst_74 = arith.constant dense<0.000000e+00> : vector<8x8xf32>
    %176 = tpu.matmul %175, %162, %cst_74 {dimension_numbers = #tpu.dot_dimension_numbers<[1], [0], [0], [1], [0, 0, 1, 1], [], []>} : vector<8x16xf32>, vector<16x8xf32>, vector<8x8xf32> -> vector<8x8xf32>
    %c0_75 = arith.constant 0 : index
    %c8_76 = arith.constant 8 : index
    %177 = vector.load %arg21[%c0_75, %c8_76] : memref<8x32xf32, #tpu.memory_space<vmem>>, vector<8x8xf32>
    tpu.vector_store %arg21[%c0_75, %c8_76], %176 {strides = array<i32>} : memref<8x32xf32, #tpu.memory_space<vmem>>, vector<8x8xf32>,
    %178 = vector.extract_strided_slice %137 {offsets = [0, 16], sizes = [8, 8], strides = [1, 1]} : vector<8x32xf32> to vector<8x8xf32>
    %179 = vector.extract_strided_slice %140 {offsets = [0, 16], sizes = [16, 8], strides = [1, 1]} : vector<16x32xf32> to vector<16x8xf32>
    %180 = vector.extract_strided_slice %141 {offsets = [0, 16], sizes = [16, 8], strides = [1, 1]} : vector<16x32xf32> to vector<16x8xf32>
    %cst_77 = arith.constant dense<0.000000e+00> : vector<8x16xf32>
    %181 = tpu.matmul %178, %179, %cst_77 {dimension_numbers = #tpu.dot_dimension_numbers<[1], [1], [0], [0], [0, 0, 1, 0], [], []>} : vector<8x8xf32>, vector<16x8xf32>, vector<8x16xf32> -> vector<8x16xf32>
    %cst_78 = arith.constant 0.353553385 : f32
    %182 = vector.broadcast %cst_78 : f32 to vector<8x16xf32>
    %183 = arith.mulf %181, %182 : vector<8x16xf32>
    %cst_79 = arith.constant dense<0xFF800000> : vector<8xf32>
    %184 = vector.multi_reduction <maximumf>, %183, %cst_79 [1] : vector<8x16xf32> to vector<8xf32>
    %185 = vector.shape_cast %184 : vector<8xf32> to vector<8x1xf32>
    %186 = vector.broadcast %185 : vector<8x1xf32> to vector<8x16xf32>
    %187 = arith.subf %183, %186 : vector<8x16xf32>
    %188 = math.exp %187 : vector<8x16xf32>
    %cst_80 = arith.constant dense<0.000000e+00> : vector<8xf32>
    %189 = vector.multi_reduction <add>, %188, %cst_80 [1] : vector<8x16xf32> to vector<8xf32>
    %190 = vector.shape_cast %189 : vector<8xf32> to vector<8x1xf32>
    %191 = tpu.reciprocal %190 {approx = true} : vector<8x1xf32> -> vector<8x1xf32>
    %192 = vector.broadcast %191 : vector<8x1xf32> to vector<8x16xf32>
    %193 = arith.mulf %188, %192 : vector<8x16xf32>
    %cst_81 = arith.constant dense<0.000000e+00> : vector<8x8xf32>
    %194 = tpu.matmul %193, %180, %cst_81 {dimension_numbers = #tpu.dot_dimension_numbers<[1], [0], [0], [1], [0, 0, 1, 1], [], []>} : vector<8x16xf32>, vector<16x8xf32>, vector<8x8xf32> -> vector<8x8xf32>
    %c0_82 = arith.constant 0 : index
    %c16_83 = arith.constant 16 : index
    %195 = vector.load %arg21[%c0_82, %c16_83] : memref<8x32xf32, #tpu.memory_space<vmem>>, vector<8x8xf32>
    tpu.vector_store %arg21[%c0_82, %c16_83], %194 {strides = array<i32>} : memref<8x32xf32, #tpu.memory_space<vmem>>, vector<8x8xf32>,
    %196 = vector.extract_strided_slice %137 {offsets = [0, 24], sizes = [8, 8], strides = [1, 1]} : vector<8x32xf32> to vector<8x8xf32>
    %197 = vector.extract_strided_slice %140 {offsets = [0, 24], sizes = [16, 8], strides = [1, 1]} : vector<16x32xf32> to vector<16x8xf32>
    %198 = vector.extract_strided_slice %141 {offsets = [0, 24], sizes = [16, 8], strides = [1, 1]} : vector<16x32xf32> to vector<16x8xf32>
    %cst_84 = arith.constant dense<0.000000e+00> : vector<8x16xf32>
    %199 = tpu.matmul %196, %197, %cst_84 {dimension_numbers = #tpu.dot_dimension_numbers<[1], [1], [0], [0], [0, 0, 1, 0], [], []>} : vector<8x8xf32>, vector<16x8xf32>, vector<8x16xf32> -> vector<8x16xf32>
    %cst_85 = arith.constant 0.353553385 : f32
    %200 = vector.broadcast %cst_85 : f32 to vector<8x16xf32>
    %201 = arith.mulf %199, %200 : vector<8x16xf32>
    %cst_86 = arith.constant dense<0xFF800000> : vector<8xf32>
    %202 = vector.multi_reduction <maximumf>, %201, %cst_86 [1] : vector<8x16xf32> to vector<8xf32>
    %203 = vector.shape_cast %202 : vector<8xf32> to vector<8x1xf32>
    %204 = vector.broadcast %203 : vector<8x1xf32> to vector<8x16xf32>
    %205 = arith.subf %201, %204 : vector<8x16xf32>
    %206 = math.exp %205 : vector<8x16xf32>
    %cst_87 = arith.constant dense<0.000000e+00> : vector<8xf32>
    %207 = vector.multi_reduction <add>, %206, %cst_87 [1] : vector<8x16xf32> to vector<8xf32>
    %208 = vector.shape_cast %207 : vector<8xf32> to vector<8x1xf32>
    %209 = tpu.reciprocal %208 {approx = true} : vector<8x1xf32> -> vector<8x1xf32>
    %210 = vector.broadcast %209 : vector<8x1xf32> to vector<8x16xf32>
    %211 = arith.mulf %206, %210 : vector<8x16xf32>
    %cst_88 = arith.constant dense<0.000000e+00> : vector<8x8xf32>
    %212 = tpu.matmul %211, %198, %cst_88 {dimension_numbers = #tpu.dot_dimension_numbers<[1], [0], [0], [1], [0, 0, 1, 1], [], []>} : vector<8x16xf32>, vector<16x8xf32>, vector<8x8xf32> -> vector<8x8xf32>
    %c0_89 = arith.constant 0 : index
    %c24_90 = arith.constant 24 : index
    %213 = vector.load %arg21[%c0_89, %c24_90] : memref<8x32xf32, #tpu.memory_space<vmem>>, vector<8x8xf32>
    tpu.vector_store %arg21[%c0_89, %c24_90], %212 {strides = array<i32>} : memref<8x32xf32, #tpu.memory_space<vmem>>, vector<8x8xf32>,
    %c0_91 = arith.constant 0 : index
    %c0_92 = arith.constant 0 : index
    %214 = vector.load %arg21[%c0_91, %c0_92] : memref<8x32xf32, #tpu.memory_space<vmem>>, vector<8x32xf32>
    %c0_93 = arith.constant 0 : index
    %c0_94 = arith.constant 0 : index
    %215 = vector.load %arg14[%c0_93, %c0_94] : memref<32x32xf32, #tpu.memory_space<vmem>>, vector<32x32xf32>
    %cst_95 = arith.constant dense<0.000000e+00> : vector<8x32xf32>
    %216 = tpu.matmul %214, %215, %cst_95 {dimension_numbers = #tpu.dot_dimension_numbers<[1], [0], [0], [1], [0, 0, 1, 1], [], []>} : vector<8x32xf32>, vector<32x32xf32>, vector<8x32xf32> -> vector<8x32xf32>
    %217 = arith.addf %111, %216 : vector<8x32xf32>
    %c0_96 = arith.constant 0 : index
    %c0_97 = arith.constant 0 : index
    %218 = vector.load %arg15[%c0_96, %c0_97] : memref<1x32xf32, #tpu.memory_space<vmem>>, vector<1x32xf32>
    %219 = vector.broadcast %218 : vector<1x32xf32> to vector<8x32xf32>
    %220 = arith.addf %217, %219 : vector<8x32xf32>
    %cst_98 = arith.constant dense<0.000000e+00> : vector<8xf32>
    %221 = vector.multi_reduction <add>, %220, %cst_98 [1] : vector<8x32xf32> to vector<8xf32>
    %222 = vector.shape_cast %221 : vector<8xf32> to vector<8x1xf32>
    %cst_99 = arith.constant 3.200000e+01 : f32
    %223 = vector.broadcast %cst_99 : f32 to vector<8x1xf32>
    %224 = arith.divf %222, %223 : vector<8x1xf32>
    %225 = vector.broadcast %224 : vector<8x1xf32> to vector<8x32xf32>
    %226 = arith.subf %220, %225 : vector<8x32xf32>
    %227 = arith.mulf %226, %226 : vector<8x32xf32>
    %cst_100 = arith.constant dense<0.000000e+00> : vector<8xf32>
    %228 = vector.multi_reduction <add>, %227, %cst_100 [1] : vector<8x32xf32> to vector<8xf32>
    %229 = vector.shape_cast %228 : vector<8xf32> to vector<8x1xf32>
    %cst_101 = arith.constant 3.200000e+01 : f32
    %230 = vector.broadcast %cst_101 : f32 to vector<8x1xf32>
    %231 = arith.divf %229, %230 : vector<8x1xf32>
    %232 = vector.broadcast %224 : vector<8x1xf32> to vector<8x32xf32>
    %233 = arith.subf %220, %232 : vector<8x32xf32>
    %cst_102 = arith.constant 9.99999974E-6 : f32
    %234 = vector.broadcast %cst_102 : f32 to vector<8x1xf32>
    %235 = arith.addf %231, %234 : vector<8x1xf32>
    %236 = math.rsqrt %235 : vector<8x1xf32>
    %237 = vector.broadcast %236 : vector<8x1xf32> to vector<8x32xf32>
    %238 = arith.mulf %233, %237 : vector<8x32xf32>
    %c0_103 = arith.constant 0 : index
    %c0_104 = arith.constant 0 : index
    %239 = vector.load %arg7[%c0_103, %c0_104] : memref<1x32xf32, #tpu.memory_space<vmem>>, vector<1x32xf32>
    %240 = vector.broadcast %239 : vector<1x32xf32> to vector<8x32xf32>
    %241 = arith.mulf %238, %240 : vector<8x32xf32>
    %c0_105 = arith.constant 0 : index
    %c0_106 = arith.constant 0 : index
    %242 = vector.load %arg8[%c0_105, %c0_106] : memref<1x32xf32, #tpu.memory_space<vmem>>, vector<1x32xf32>
    %243 = vector.broadcast %242 : vector<1x32xf32> to vector<8x32xf32>
    %244 = arith.addf %241, %243 : vector<8x32xf32>
    %c0_107 = arith.constant 0 : index
    %c0_108 = arith.constant 0 : index
    %245 = vector.load %arg16[%c0_107, %c0_108] : memref<32x128xf32, #tpu.memory_space<vmem>>, vector<32x128xf32>
    %cst_109 = arith.constant dense<0.000000e+00> : vector<8x128xf32>
    %246 = tpu.matmul %244, %245, %cst_109 {dimension_numbers = #tpu.dot_dimension_numbers<[1], [0], [0], [1], [0, 0, 1, 1], [], []>} : vector<8x32xf32>, vector<32x128xf32>, vector<8x128xf32> -> vector<8x128xf32>
    %c0_110 = arith.constant 0 : index
    %c0_111 = arith.constant 0 : index
    %247 = vector.load %arg17[%c0_110, %c0_111] : memref<1x128xf32, #tpu.memory_space<vmem>>, vector<1x128xf32>
    %248 = vector.broadcast %247 : vector<1x128xf32> to vector<8x128xf32>
    %249 = arith.addf %246, %248 : vector<8x128xf32>
    %cst_112 = arith.constant 5.000000e-01 : f32
    %250 = vector.broadcast %cst_112 : f32 to vector<8x128xf32>
    %251 = arith.mulf %250, %249 : vector<8x128xf32>
    %cst_113 = arith.constant 0.707106769 : f32
    %252 = vector.broadcast %cst_113 : f32 to vector<8x128xf32>
    %253 = arith.mulf %249, %252 : vector<8x128xf32>
    %254 = math.erf %253 : vector<8x128xf32>
    %cst_114 = arith.constant 1.000000e+00 : f32
    %255 = vector.broadcast %cst_114 : f32 to vector<8x128xf32>
    %256 = arith.addf %255, %254 : vector<8x128xf32>
    %257 = arith.mulf %251, %256 : vector<8x128xf32>
    %c0_115 = arith.constant 0 : index
    %c0_116 = arith.constant 0 : index
    %258 = vector.load %arg18[%c0_115, %c0_116] : memref<128x32xf32, #tpu.memory_space<vmem>>, vector<128x32xf32>
    %cst_117 = arith.constant dense<0.000000e+00> : vector<8x32xf32>
    %259 = tpu.matmul %257, %258, %cst_117 {dimension_numbers = #tpu.dot_dimension_numbers<[1], [0], [0], [1], [0, 0, 1, 1], [], []>} : vector<8x128xf32>, vector<128x32xf32>, vector<8x32xf32> -> vector<8x32xf32>
    %c0_118 = arith.constant 0 : index
    %c0_119 = arith.constant 0 : index
    %260 = vector.load %arg19[%c0_118, %c0_119] : memref<1x32xf32, #tpu.memory_space<vmem>>, vector<1x32xf32>
    %261 = vector.broadcast %260 : vector<1x32xf32> to vector<8x32xf32>
    %262 = arith.addf %259, %261 : vector<8x32xf32>
    %263 = arith.addf %220, %262 : vector<8x32xf32>
    %c0_120 = arith.constant 0 : index
    %c0_121 = arith.constant 0 : index
    %c0_122 = arith.constant 0 : index
    %264 = vector.load %arg20[%c0_120, %c0_121, %c0_122] : memref<1x8x32xf32, #tpu.memory_space<vmem>>, vector<1x8x32xf32>
    %265 = vector.shape_cast %264 : vector<1x8x32xf32> to vector<8x32xf32>
    %266 = vector.shape_cast %263 : vector<8x32xf32> to vector<1x8x32xf32>
    tpu.vector_store %arg20[%c0_120, %c0_121, %c0_122], %266 {strides = array<i32>} : memref<1x8x32xf32, #tpu.memory_space<vmem>>, vector<1x8x32xf32>,
    return
  }
  func.func @transform_0(%arg0: i32) -> (i32, i32, i32) {
    %c0_i32 = arith.constant 0 : i32
    %c0_i32_0 = arith.constant 0 : i32
    %c0_i32_1 = arith.constant 0 : i32
    return %arg0, %c0_i32, %c0_i32_0 : i32, i32, i32
  }
  func.func @transform_1(%arg0: i32) -> (i32, i32, i32) {
    %c0_i32 = arith.constant 0 : i32
    %c0_i32_0 = arith.constant 0 : i32
    %c0_i32_1 = arith.constant 0 : i32
    return %arg0, %c0_i32, %c0_i32_0 : i32, i32, i32
  }
  func.func @transform_2(%arg0: i32) -> (i32, i32) {
    %c0_i32 = arith.constant 0 : i32
    %c0_i32_0 = arith.constant 0 : i32
    %c0_i32_1 = arith.constant 0 : i32
    return %c0_i32, %c0_i32_0 : i32, i32
  }
  func.func @transform_3(%arg0: i32) -> (i32, i32) {
    %c0_i32 = arith.constant 0 : i32
    %c0_i32_0 = arith.constant 0 : i32
    %c0_i32_1 = arith.constant 0 : i32
    return %c0_i32, %c0_i32_0 : i32, i32
  }
  func.func @transform_4(%arg0: i32) -> (i32, i32) {
    %c0_i32 = arith.constant 0 : i32
    %c0_i32_0 = arith.constant 0 : i32
    %c0_i32_1 = arith.constant 0 : i32
    return %c0_i32, %c0_i32_0 : i32, i32
  }
  func.func @transform_5(%arg0: i32) -> (i32, i32) {
    %c0_i32 = arith.constant 0 : i32
    %c0_i32_0 = arith.constant 0 : i32
    %c0_i32_1 = arith.constant 0 : i32
    return %c0_i32, %c0_i32_0 : i32, i32
  }
  func.func @transform_6(%arg0: i32) -> (i32, i32) {
    %c0_i32 = arith.constant 0 : i32
    %c0_i32_0 = arith.constant 0 : i32
    %c0_i32_1 = arith.constant 0 : i32
    return %c0_i32, %c0_i32_0 : i32, i32
  }
  func.func @transform_7(%arg0: i32) -> (i32, i32) {
    %c0_i32 = arith.constant 0 : i32
    %c0_i32_0 = arith.constant 0 : i32
    %c0_i32_1 = arith.constant 0 : i32
    return %c0_i32, %c0_i32_0 : i32, i32
  }
  func.func @transform_8(%arg0: i32) -> (i32, i32) {
    %c0_i32 = arith.constant 0 : i32
    %c0_i32_0 = arith.constant 0 : i32
    %c0_i32_1 = arith.constant 0 : i32
    return %c0_i32, %c0_i32_0 : i32, i32
  }
  func.func @transform_9(%arg0: i32) -> (i32, i32) {
    %c0_i32 = arith.constant 0 : i32
    %c0_i32_0 = arith.constant 0 : i32
    %c0_i32_1 = arith.constant 0 : i32
    return %c0_i32, %c0_i32_0 : i32, i32
  }
  func.func @transform_10(%arg0: i32) -> (i32, i32) {
    %c0_i32 = arith.constant 0 : i32
    %c0_i32_0 = arith.constant 0 : i32
    %c0_i32_1 = arith.constant 0 : i32
    return %c0_i32, %c0_i32_0 : i32, i32
  }
  func.func @transform_11(%arg0: i32) -> (i32, i32) {
    %c0_i32 = arith.constant 0 : i32
    %c0_i32_0 = arith.constant 0 : i32
    %c0_i32_1 = arith.constant 0 : i32
    return %c0_i32, %c0_i32_0 : i32, i32
  }
  func.func @transform_12(%arg0: i32) -> (i32, i32) {
    %c0_i32 = arith.constant 0 : i32
    %c0_i32_0 = arith.constant 0 : i32
    %c0_i32_1 = arith.constant 0 : i32
    return %c0_i32, %c0_i32_0 : i32, i32
  }
  func.func @transform_13(%arg0: i32) -> (i32, i32) {
    %c0_i32 = arith.constant 0 : i32
    %c0_i32_0 = arith.constant 0 : i32
    %c0_i32_1 = arith.constant 0 : i32
    return %c0_i32, %c0_i32_0 : i32, i32
  }
  func.func @transform_14(%arg0: i32) -> (i32, i32) {
    %c0_i32 = arith.constant 0 : i32
    %c0_i32_0 = arith.constant 0 : i32
    %c0_i32_1 = arith.constant 0 : i32
    return %c0_i32, %c0_i32_0 : i32, i32
  }
  func.func @transform_15(%arg0: i32) -> (i32, i32) {
    %c0_i32 = arith.constant 0 : i32
    %c0_i32_0 = arith.constant 0 : i32
    %c0_i32_1 = arith.constant 0 : i32
    return %c0_i32, %c0_i32_0 : i32, i32
  }
  func.func @transform_16(%arg0: i32) -> (i32, i32) {
    %c0_i32 = arith.constant 0 : i32
    %c0_i32_0 = arith.constant 0 : i32
    %c0_i32_1 = arith.constant 0 : i32
    return %c0_i32, %c0_i32_0 : i32, i32
  }
  func.func @transform_17(%arg0: i32) -> (i32, i32) {
    %c0_i32 = arith.constant 0 : i32
    %c0_i32_0 = arith.constant 0 : i32
    %c0_i32_1 = arith.constant 0 : i32
    return %c0_i32, %c0_i32_0 : i32, i32
  }
  func.func @transform_18(%arg0: i32) -> (i32, i32) {
    %c0_i32 = arith.constant 0 : i32
    %c0_i32_0 = arith.constant 0 : i32
    %c0_i32_1 = arith.constant 0 : i32
    return %c0_i32, %c0_i32_0 : i32, i32
  }
  func.func @transform_19(%arg0: i32) -> (i32, i32, i32) {
    %c0_i32 = arith.constant 0 : i32
    %c0_i32_0 = arith.constant 0 : i32
    %c0_i32_1 = arith.constant 0 : i32
    return %arg0, %c0_i32, %c0_i32_0 : i32, i32, i32
  }
}

module attributes {stable_mosaic.version = 11 : i64} {
  func.func @_ln_linear_kernel(%arg0: i32, %arg1: memref<16x32xf32, #tpu.memory_space<vmem>>, %arg2: memref<1x32xf32, #tpu.memory_space<vmem>>, %arg3: memref<1x32xf32, #tpu.memory_space<vmem>>, %arg4: memref<32x64xf32, #tpu.memory_space<vmem>>, %arg5: memref<1x64xf32, #tpu.memory_space<vmem>>, %arg6: memref<1x64xf32, #tpu.memory_space<vmem>>, %arg7: memref<1x64xf32, #tpu.memory_space<vmem>>, %arg8: memref<16x64xf32, #tpu.memory_space<vmem>>) attributes {dimension_semantics = [#tpu.dimension_semantics<parallel>], iteration_bounds = array<i64: 1>, scalar_prefetch = 0 : i64, scratch_operands = 0 : i64, tpu.core_type = #tpu.core_type<tc>, window_params = [{transform_indices = @transform_0, window_bounds = array<i64: 16, 32>}, {pipeline_mode = #tpu.pipeline_mode<synchronous>, transform_indices = @transform_1, window_bounds = array<i64: 1, 32>}, {pipeline_mode = #tpu.pipeline_mode<synchronous>, transform_indices = @transform_2, window_bounds = array<i64: 1, 32>}, {pipeline_mode = #tpu.pipeline_mode<synchronous>, transform_indices = @transform_3, window_bounds = array<i64: 32, 64>}, {pipeline_mode = #tpu.pipeline_mode<synchronous>, transform_indices = @transform_4, window_bounds = array<i64: 1, 64>}, {pipeline_mode = #tpu.pipeline_mode<synchronous>, transform_indices = @transform_5, window_bounds = array<i64: 1, 64>}, {pipeline_mode = #tpu.pipeline_mode<synchronous>, transform_indices = @transform_6, window_bounds = array<i64: 1, 64>}, {transform_indices = @transform_7, window_bounds = array<i64: 16, 64>}]} {
    %c0 = arith.constant 0 : index
    %c0_0 = arith.constant 0 : index
    %0 = vector.load %arg1[%c0, %c0_0] : memref<16x32xf32, #tpu.memory_space<vmem>>, vector<16x32xf32>
    %cst = arith.constant dense<0.000000e+00> : vector<16xf32>
    %1 = vector.multi_reduction <add>, %0, %cst [1] : vector<16x32xf32> to vector<16xf32>
    %2 = vector.shape_cast %1 : vector<16xf32> to vector<16x1xf32>
    %cst_1 = arith.constant 3.200000e+01 : f32
    %3 = vector.broadcast %cst_1 : f32 to vector<16x1xf32>
    %4 = arith.divf %2, %3 : vector<16x1xf32>
    %5 = vector.broadcast %4 : vector<16x1xf32> to vector<16x32xf32>
    %6 = arith.subf %0, %5 : vector<16x32xf32>
    %7 = arith.mulf %6, %6 : vector<16x32xf32>
    %cst_2 = arith.constant dense<0.000000e+00> : vector<16xf32>
    %8 = vector.multi_reduction <add>, %7, %cst_2 [1] : vector<16x32xf32> to vector<16xf32>
    %9 = vector.shape_cast %8 : vector<16xf32> to vector<16x1xf32>
    %cst_3 = arith.constant 3.200000e+01 : f32
    %10 = vector.broadcast %cst_3 : f32 to vector<16x1xf32>
    %11 = arith.divf %9, %10 : vector<16x1xf32>
    %12 = vector.broadcast %4 : vector<16x1xf32> to vector<16x32xf32>
    %13 = arith.subf %0, %12 : vector<16x32xf32>
    %cst_4 = arith.constant 9.99999974E-6 : f32
    %14 = vector.broadcast %cst_4 : f32 to vector<16x1xf32>
    %15 = arith.addf %11, %14 : vector<16x1xf32>
    %16 = math.rsqrt %15 : vector<16x1xf32>
    %17 = vector.broadcast %16 : vector<16x1xf32> to vector<16x32xf32>
    %18 = arith.mulf %13, %17 : vector<16x32xf32>
    %c0_5 = arith.constant 0 : index
    %c0_6 = arith.constant 0 : index
    %19 = vector.load %arg2[%c0_5, %c0_6] : memref<1x32xf32, #tpu.memory_space<vmem>>, vector<1x32xf32>
    %20 = vector.broadcast %19 : vector<1x32xf32> to vector<16x32xf32>
    %21 = arith.mulf %18, %20 : vector<16x32xf32>
    %c0_7 = arith.constant 0 : index
    %c0_8 = arith.constant 0 : index
    %22 = vector.load %arg3[%c0_7, %c0_8] : memref<1x32xf32, #tpu.memory_space<vmem>>, vector<1x32xf32>
    %23 = vector.broadcast %22 : vector<1x32xf32> to vector<16x32xf32>
    %24 = arith.addf %21, %23 : vector<16x32xf32>
    %c0_9 = arith.constant 0 : index
    %c0_10 = arith.constant 0 : index
    %25 = vector.load %arg4[%c0_9, %c0_10] : memref<32x64xf32, #tpu.memory_space<vmem>>, vector<32x64xf32>
    %cst_11 = arith.constant dense<0.000000e+00> : vector<16x64xf32>
    %26 = tpu.matmul %24, %25, %cst_11 {dimension_numbers = #tpu.dot_dimension_numbers<[1], [0], [0], [1], [0, 0, 1, 1], [], []>} : vector<16x32xf32>, vector<32x64xf32>, vector<16x64xf32> -> vector<16x64xf32>
    %c0_12 = arith.constant 0 : index
    %c0_13 = arith.constant 0 : index
    %27 = vector.load %arg5[%c0_12, %c0_13] : memref<1x64xf32, #tpu.memory_space<vmem>>, vector<1x64xf32>
    %28 = vector.broadcast %27 : vector<1x64xf32> to vector<16x64xf32>
    %29 = arith.addf %26, %28 : vector<16x64xf32>
    %c0_14 = arith.constant 0 : index
    %c0_15 = arith.constant 0 : index
    %30 = vector.load %arg8[%c0_14, %c0_15] : memref<16x64xf32, #tpu.memory_space<vmem>>, vector<16x64xf32>
    tpu.vector_store %arg8[%c0_14, %c0_15], %29 {strides = array<i32>} : memref<16x64xf32, #tpu.memory_space<vmem>>, vector<16x64xf32>,
    return
  }
  func.func @transform_0(%arg0: i32) -> (i32, i32) {
    %c0_i32 = arith.constant 0 : i32
    %c0_i32_0 = arith.constant 0 : i32
    return %arg0, %c0_i32 : i32, i32
  }
  func.func @transform_1(%arg0: i32) -> (i32, i32) {
    %c0_i32 = arith.constant 0 : i32
    %c0_i32_0 = arith.constant 0 : i32
    %c0_i32_1 = arith.constant 0 : i32
    return %c0_i32, %c0_i32_0 : i32, i32
  }
  func.func @transform_2(%arg0: i32) -> (i32, i32) {
    %c0_i32 = arith.constant 0 : i32
    %c0_i32_0 = arith.constant 0 : i32
    %c0_i32_1 = arith.constant 0 : i32
    return %c0_i32, %c0_i32_0 : i32, i32
  }
  func.func @transform_3(%arg0: i32) -> (i32, i32) {
    %c0_i32 = arith.constant 0 : i32
    %c0_i32_0 = arith.constant 0 : i32
    %c0_i32_1 = arith.constant 0 : i32
    return %c0_i32, %c0_i32_0 : i32, i32
  }
  func.func @transform_4(%arg0: i32) -> (i32, i32) {
    %c0_i32 = arith.constant 0 : i32
    %c0_i32_0 = arith.constant 0 : i32
    %c0_i32_1 = arith.constant 0 : i32
    return %c0_i32, %c0_i32_0 : i32, i32
  }
  func.func @transform_5(%arg0: i32) -> (i32, i32) {
    %c0_i32 = arith.constant 0 : i32
    %c0_i32_0 = arith.constant 0 : i32
    %c0_i32_1 = arith.constant 0 : i32
    return %c0_i32, %c0_i32_0 : i32, i32
  }
  func.func @transform_6(%arg0: i32) -> (i32, i32) {
    %c0_i32 = arith.constant 0 : i32
    %c0_i32_0 = arith.constant 0 : i32
    %c0_i32_1 = arith.constant 0 : i32
    return %c0_i32, %c0_i32_0 : i32, i32
  }
  func.func @transform_7(%arg0: i32) -> (i32, i32) {
    %c0_i32 = arith.constant 0 : i32
    %c0_i32_0 = arith.constant 0 : i32
    return %arg0, %c0_i32 : i32, i32
  }
}

</mosaic_0001>

<bundles_post_ra>
// kernel: context_decoder_forward.6
= control target key start
LH: loop header
LB: loop body
LE: loop exit
PB: predicated region body
PF: predicated region fallthrough
CT: control target
= control target key end

     0   :  { %vm28_vm0 = vcmask 523264   ;;  %vm170_vm1 = vcmask 261120   ;;  %s322_s0 = inlined_call_operand.vmem [shape: f32[16,64], index: 0, kind: input, shape index: {}]   ;;  %s323_s5 = inlined_call_operand.vmem [shape: f32[1,32], index: 5, kind: input, shape index: {}]   ;;  %s324_s6 = inlined_call_operand.vmem [shape: f32[1,32], index: 6, kind: input, shape index: {}]   ;;  %s325_s3 = inlined_call_operand.vmem [shape: f32[64,32], index: 3, kind: input, shape index: {}]   ;;  %s326_s1 = inlined_call_operand.vmem [shape: f32[1,64], index: 1, kind: input, shape index: {}]   ;;  %s327_s2 = inlined_call_operand.vmem [shape: f32[1,64], index: 2, kind: input, shape index: {}]   ;;  %s328_s4 = inlined_call_operand.vmem [shape: f32[1,32], index: 4, kind: input, shape index: {}]   ;;  %s329_s7 = inlined_call_operand.vmem [shape: f32[16,32], index: 7, kind: output, shape index: {}]  }
   0x1   :  { %v26_v0 = vld [vmem:[%s322_s0] sm:$0xff]  ;;  %v27_v1 = vld [vmem:[%s322_s0 + $0x8] sm:$0xff]  ;;  %v76_v17 = vld [vmem:[%s325_s3 + $0x10] sm:$0xff] }
   0x2   :  { %v29_v2 = vsel %vm28_vm0, %v26_v0, 0.0  ;;  %v32_v3 = vsel %vm28_vm0, %v27_v1, 0.0  ;;  %v74_v14 = vld [vmem:[%s325_s3] sm:$0xff]  ;;  %v75_v15 = vld [vmem:[%s325_s3 + $0x8] sm:$0xff]  ;;  %v77_v18 = vld [vmem:[%s325_s3 + $0x18] sm:$0xff] }
   0x3   :  { %30 = vadd.xlane.f32.xlu0 %v29_v2  ;;  %v211_v16 = vpack.c.bf16 %v75_v15, %v74_v14  ;;  %v78_v19 = vld [vmem:[%s325_s3 + $0x20] sm:$0xff]  ;;  %v215_v20 = vpack.c.bf16 %v77_v18, %v76_v17  ;;  %v79_v21 = vld [vmem:[%s325_s3 + $0x28] sm:$0xff]  ;;  %v80_v23 = vld [vmem:[%s325_s3 + $0x30] sm:$0xff] }
   0x4   :  { %v219_v22 = vpack.c.bf16 %v79_v21, %v78_v19  ;;  %v81_v24 = vld [vmem:[%s325_s3 + $0x38] sm:$0xff]  ;;  %v177_v33 = vld [vmem:[%s326_s1] ss:$0 sm:$0xff] }
   0x5   :  { %212 = vmatprep.subr.bf16.mxu0 %v211_v16  ;;  %v223_v25 = vpack.c.bf16 %v81_v24, %v80_v23  ;;  %v178_v35 = vld [vmem:[%s327_s2] ss:$0 sm:$0xff] }
   0x6   :  { %214 = vmatpush3.bf16.msra.mxu0 %v211_v16  ;;  %v179_v42 = vld [vmem:[%s328_s4] ss:$0 sm:$0xff] }
   0x7   :  { %33 = vadd.xlane.f32.xlu0 %v32_v3  ;;  %216 = vmatprep.subr.bf16.mxu0 %v215_v20 }
   0xa   :  { %218 = vmatpush3.bf16.msra.mxu0 %v215_v20 }
   0xb   :  { %220 = vmatprep.subr.bf16.mxu0 %v219_v22 }
   0xe   :  { %222 = vmatpush3.bf16.msra.mxu0 %v219_v22 }
   0xf   :  { %224 = vmatprep.subr.bf16.mxu0 %v223_v25 }
  0x12   :  { %226 = vmatpush3.bf16.msra.mxu0 %v223_v25 }
  0x90   :  { %v31_v4 = vpop.xlane.xlu0 %30 }
  0x91   :  { %v36_v5 = vmul.f32 0.015625, %v31_v4 }
  0x93   :  { %v38_v6 = vsub.f32 %v26_v0, %v36_v5 }
  0x94   :  { %v34_v7 = vpop.xlane.xlu0 %33 }
  0x95   :  { %v37_v8 = vmul.f32 0.015625, %v34_v7  ;;  %v40_v9 = vmul.f32 %v38_v6, %v38_v6 }
  0x97   :  { %v39_v10 = vsub.f32 %v27_v1, %v37_v8  ;;  %v42_v11 = vsel %vm28_vm0, %v40_v9, 0.0 }
  0x98   :  { %43 = vadd.xlane.f32.xlu1 %v42_v11 }
  0x99   :  { %v41_v12 = vmul.f32 %v39_v10, %v39_v10 }
  0x9b   :  { %v45_v13 = vsel %vm28_vm0, %v41_v12, 0.0 }
  0x9c   :  { %46 = vadd.xlane.f32.xlu1 %v45_v13 }
 0x125   :  { %v44_v26 = vpop.xlane.xlu1 %43 }
 0x126   :  { %v48_v27 = vmul.f32 0.015625, %v44_v26 }
 0x128   :  { %v50_v28 = vadd.f32 1e-05, %v48_v27 }
 0x129   :  { %v47_v29 = vpop.xlane.xlu1 %46 }
 0x12a   :  { %227 = vrsqrt.f32 %v50_v28  ;;  %v49_v30 = vmul.f32 0.015625, %v47_v29 }
 0x12c   :  { %v51_v31 = vadd.f32 1e-05, %v49_v30 }
 0x12e   :  { %229 = vrsqrt.f32 %v51_v31 }
 0x134   :  { %v228_v32 = vpop.eup %227 }
 0x135   :  { %v54_v34 = vmul.f32 %v228_v32, %v38_v6 }
 0x137   :  { %v63_v36 = vmul.f32 %v177_v33, %v54_v34 }
 0x138   :  { %v230_v37 = vpop.eup %229 }
 0x139   :  { %v55_v38 = vmul.f32 %v230_v37, %v39_v10  ;;  %v72_v39 = vadd.f32 %v178_v35, %v63_v36 }
 0x13b   :  { %v64_v40 = vmul.f32 %v177_v33, %v55_v38  ;;  %208 = vmatprep.mubr.msk.f32.mxu0 %vm28_vm0, %v72_v39 }
 0x13d   :  { %v73_v41 = vadd.f32 %v178_v35, %v64_v40 }
 0x13f   :  { %209 = vmatmul.mubr.msk.f32.vlgmr.msra.gmra.mrb[0].mxu0 %vm28_vm0, %v73_v41 }
 0x212   :  { %v210_v43 = vpop.f32.mrb[0].mxu0 }
 0x213   :  { %v167_v44 = vadd.f32 %v210_v43, %v179_v42  ;;  %v161_v45 = vpop.f32.mrb[1].mxu0 }
 0x214   :  { %v162_v46 = vadd.f32 %v179_v42, %v161_v45 }
 0x215   :  { %172 = vst.msk [vmem:[%s329_s7 + $0x8] sm:$0xff] %vm170_vm1, %v167_v44 }
 0x216   :  { %171 = vst.msk [vmem:[%s329_s7] sm:$0xff] %vm170_vm1, %v162_v46 }

// kernel: context_decoder_forward.5
= control target key start
LH: loop header
LB: loop body
LE: loop exit
PB: predicated region body
PF: predicated region fallthrough
CT: control target
= control target key end

     0   :  { %vm30_vm0 = vcmask 523264   ;;  %vm218_vm1 = vcmask 261120   ;;  %s532_s0 = inlined_call_operand.vmem [shape: f32[32,64], index: 0, kind: input, shape index: {}]   ;;  %s533_s3 = inlined_call_operand.vmem [shape: f32[64,32], index: 3, kind: input, shape index: {}]   ;;  %s534_s1 = inlined_call_operand.vmem [shape: f32[1,64], index: 1, kind: input, shape index: {}]   ;;  %s535_s2 = inlined_call_operand.vmem [shape: f32[1,64], index: 2, kind: input, shape index: {}]   ;;  %s536_s4 = inlined_call_operand.vmem [shape: f32[1,32], index: 4, kind: input, shape index: {}]   ;;  %s537_s5 = inlined_call_operand.vmem [shape: f32[1,32], index: 5, kind: input, shape index: {}]   ;;  %s538_s6 = inlined_call_operand.vmem [shape: f32[1,32], index: 6, kind: input, shape index: {}]   ;;  %s539_s7 = inlined_call_operand.vmem [shape: f32[32,32], index: 7, kind: output, shape index: {}]  }
   0x1   :  { %v26_v0 = vld [vmem:[%s532_s0] sm:$0xff]  ;;  %v27_v1 = vld [vmem:[%s532_s0 + $0x8] sm:$0xff]  ;;  %v28_v2 = vld [vmem:[%s532_s0 + $0x10] sm:$0xff] }
   0x2   :  { %v31_v3 = vsel %vm30_vm0, %v26_v0, 0.0  ;;  %v34_v4 = vsel %vm30_vm0, %v27_v1, 0.0  ;;  %v29_v5 = vld [vmem:[%s532_s0 + $0x18] sm:$0xff]  ;;  %v37_v6 = vsel %vm30_vm0, %v28_v2, 0.0  ;;  %v106_v28 = vld [vmem:[%s533_s3] sm:$0xff]  ;;  %v107_v29 = vld [vmem:[%s533_s3 + $0x8] sm:$0xff] }
   0x3   :  { %32 = vadd.xlane.f32.xlu0 %v31_v3  ;;  %35 = vadd.xlane.f32.xlu1 %v34_v4  ;;  %v40_v7 = vsel %vm30_vm0, %v29_v5, 0.0  ;;  %v345_v30 = vpack.c.bf16 %v107_v29, %v106_v28  ;;  %v108_v31 = vld [vmem:[%s533_s3 + $0x10] sm:$0xff]  ;;  %v109_v32 = vld [vmem:[%s533_s3 + $0x18] sm:$0xff]  ;;  %v110_v34 = vld [vmem:[%s533_s3 + $0x20] sm:$0xff] }
   0x4   :  { %v349_v33 = vpack.c.bf16 %v109_v32, %v108_v31  ;;  %v111_v35 = vld [vmem:[%s533_s3 + $0x28] sm:$0xff]  ;;  %v112_v37 = vld [vmem:[%s533_s3 + $0x30] sm:$0xff]  ;;  %v113_v38 = vld [vmem:[%s533_s3 + $0x38] sm:$0xff] }
   0x5   :  { %346 = vmatprep.subr.bf16.mxu0 %v345_v30  ;;  %361 = vmatprep.subr.bf16.mxu1 %v345_v30  ;;  %v353_v36 = vpack.c.bf16 %v111_v35, %v110_v34  ;;  %v357_v39 = vpack.c.bf16 %v113_v38, %v112_v37  ;;  %v302_v53 = vld [vmem:[%s534_s1] ss:$0 sm:$0xff] }
   0x6   :  { %348 = vmatpush3.bf16.msra.mxu0 %v345_v30  ;;  %365 = vmatpush3.bf16.msra.mxu1 %v345_v30  ;;  %v303_v55 = vld [vmem:[%s535_s2] ss:$0 sm:$0xff] }
   0x7   :  { %38 = vadd.xlane.f32.xlu0 %v37_v6  ;;  %41 = vadd.xlane.f32.xlu1 %v40_v7  ;;  %v304_v6 = vld [vmem:[%s536_s4] ss:$0 sm:$0xff] }
   0x8   :  { %350 = vmatprep.subr.bf16.mxu0 %v349_v33  ;;  %362 = vmatprep.subr.bf16.mxu1 %v349_v33 }
   0xa   :  { %352 = vmatpush3.bf16.msra.mxu0 %v349_v33  ;;  %366 = vmatpush3.bf16.msra.mxu1 %v349_v33 }
   0xb   :  { %354 = vmatprep.subr.bf16.mxu0 %v353_v36  ;;  %363 = vmatprep.subr.bf16.mxu1 %v353_v36 }
   0xe   :  { %356 = vmatpush3.bf16.msra.mxu0 %v353_v36  ;;  %367 = vmatpush3.bf16.msra.mxu1 %v353_v36 }
   0xf   :  { %358 = vmatprep.subr.bf16.mxu0 %v357_v39  ;;  %364 = vmatprep.subr.bf16.mxu1 %v357_v39 }
  0x12   :  { %360 = vmatpush3.bf16.msra.mxu0 %v357_v39  ;;  %368 = vmatpush3.bf16.msra.mxu1 %v357_v39 }
  0x90   :  { %v33_v8 = vpop.xlane.xlu0 %32  ;;  %v36_v9 = vpop.xlane.xlu1 %35 }
  0x91   :  { %v44_v10 = vmul.f32 0.015625, %v33_v8  ;;  %v45_v11 = vmul.f32 0.015625, %v36_v9 }
  0x93   :  { %v441_v12 = vsub.f32 %v26_v0, %v44_v10  ;;  %v443_v13 = vsub.f32 %v27_v1, %v45_v11 }
  0x94   :  { %v39_v14 = vpop.xlane.xlu0 %38  ;;  %v42_v15 = vpop.xlane.xlu1 %41 }
  0x95   :  { %v46_v16 = vmul.f32 0.015625, %v39_v14  ;;  %v47_v17 = vmul.f32 0.015625, %v42_v15  ;;  %v52_v18 = vmul.f32 %v441_v12, %v441_v12  ;;  %v53_v19 = vmul.f32 %v443_v13, %v443_v13 }
  0x97   :  { %v449_v20 = vsub.f32 %v28_v2, %v46_v16  ;;  %v451_v21 = vsub.f32 %v29_v5, %v47_v17  ;;  %v56_v22 = vsel %vm30_vm0, %v52_v18, 0.0  ;;  %v59_v23 = vsel %vm30_vm0, %v53_v19, 0.0 }
  0x98   :  { %57 = vadd.xlane.f32.xlu0 %v56_v22 }
  0x99   :  { %v54_v24 = vmul.f32 %v449_v20, %v449_v20  ;;  %v55_v25 = vmul.f32 %v451_v21, %v451_v21 }
  0x9b   :  { %v62_v26 = vsel %vm30_vm0, %v54_v24, 0.0  ;;  %v65_v27 = vsel %vm30_vm0, %v55_v25, 0.0 }
  0x9c   :  { %60 = vadd.xlane.f32.xlu0 %v59_v23  ;;  %63 = vadd.xlane.f32.xlu1 %v62_v26 }
  0xa0   :  { %66 = vadd.xlane.f32.xlu1 %v65_v27 }
 0x125   :  { %v58_v40 = vpop.xlane.xlu0 %57 }
 0x126   :  { %v68_v41 = vmul.f32 0.015625, %v58_v40 }
 0x128   :  { %v72_v42 = vadd.f32 1e-05, %v68_v41 }
 0x129   :  { %v64_v43 = vpop.xlane.xlu1 %63  ;;  %v61_v44 = vpop.xlane.xlu0 %60 }
 0x12a   :  { %369 = vrsqrt.f32 %v72_v42  ;;  %v70_v45 = vmul.f32 0.015625, %v64_v43  ;;  %v69_v46 = vmul.f32 0.015625, %v61_v44 }
 0x12c   :  { %v74_v47 = vadd.f32 1e-05, %v70_v45  ;;  %v73_v48 = vadd.f32 1e-05, %v69_v46 }
 0x12d   :  { %v67_v49 = vpop.xlane.xlu1 %66 }
 0x12e   :  { %371 = vrsqrt.f32 %v74_v47  ;;  %v71_v50 = vmul.f32 0.015625, %v67_v49 }
 0x12f   :  { %373 = vrsqrt.f32 %v73_v48 }
 0x130   :  { %v75_v51 = vadd.f32 1e-05, %v71_v50 }
 0x132   :  { %375 = vrsqrt.f32 %v75_v51 }
 0x134   :  { %v370_v52 = vpop.eup %369 }
 0x135   :  { %v80_v54 = vmul.f32 %v370_v52, %v441_v12  ;;  %v309_v52 = vld [vmem:[%s537_s5] ss:$0 sm:$0xff] }
 0x137   :  { %v91_v56 = vmul.f32 %v302_v53, %v80_v54 }
 0x138   :  { %v372_v57 = vpop.eup %371 }
 0x139   :  { %v374_v58 = vpop.eup %373  ;;  %v102_v59 = vadd.f32 %v303_v55, %v91_v56  ;;  %v82_v60 = vmul.f32 %v372_v57, %v449_v20 }
 0x13a   :  { %v81_v61 = vmul.f32 %v374_v58, %v443_v13 }
 0x13b   :  { %339 = vmatprep.mubr.msk.f32.mxu0 %vm30_vm0, %v102_v59  ;;  %v93_v62 = vmul.f32 %v302_v53, %v82_v60 }
 0x13c   :  { %v376_v63 = vpop.eup %375  ;;  %v92_v0 = vmul.f32 %v302_v53, %v81_v61 }
 0x13d   :  { %v104_v1 = vadd.f32 %v303_v55, %v93_v62  ;;  %v83_v2 = vmul.f32 %v376_v63, %v451_v21 }
 0x13e   :  { %v103_v3 = vadd.f32 %v303_v55, %v92_v0 }
 0x13f   :  { %342 = vmatprep.mubr.msk.f32.mxu1 %vm30_vm0, %v104_v1  ;;  %v94_v4 = vmul.f32 %v302_v53, %v83_v2 }
 0x140   :  { %340 = vmatmul.mubr.msk.f32.vlgmr.msra.gmra.mrb[0].mxu0 %vm30_vm0, %v103_v3 }
 0x141   :  { %v105_v5 = vadd.f32 %v303_v55, %v94_v4  ;;  %v310_v55 = vld [vmem:[%s538_s6] ss:$0 sm:$0xff] }
 0x143   :  { %343 = vmatmul.mubr.msk.f32.vlgmr.msra.gmra.mrb[0].mxu1 %vm30_vm0, %v105_v5 }
 0x213   :  { %v341_v7 = vpop.f32.mrb[0].mxu0 }
 0x214   :  { %v205_v8 = vadd.f32 %v341_v7, %v304_v6  ;;  %v199_v9 = vpop.f32.mrb[1].mxu0 }
 0x215   :  { %v200_v10 = vadd.f32 %v304_v6, %v199_v9 }
 0x216   :  { %v344_v11 = vpop.f32.mrb[0].mxu1  ;;  %v222_v12 = vsel %vm218_vm1, %v205_v8, 0.0 }
 0x217   :  { %v215_v13 = vadd.f32 %v344_v11, %v304_v6  ;;  %223 = vadd.xlane.f32.xlu1 %v222_v12  ;;  %v209_v14 = vpop.f32.mrb[1].mxu1  ;;  %v219_v15 = vsel %vm218_vm1, %v200_v10, 0.0 }
 0x218   :  { %v210_v16 = vadd.f32 %v304_v6, %v209_v14  ;;  %220 = vadd.xlane.f32.xlu0 %v219_v15 }
 0x219   :  { %v228_v17 = vsel %vm218_vm1, %v215_v13, 0.0 }
 0x21a   :  { %v225_v18 = vsel %vm218_vm1, %v210_v16, 0.0 }
 0x21b   :  { %229 = vadd.xlane.f32.xlu1 %v228_v17 }
 0x21c   :  { %226 = vadd.xlane.f32.xlu0 %v225_v18 }
 0x2a4   :  { %v224_v19 = vpop.xlane.xlu1 %223 }
 0x2a5   :  { %v233_v20 = vmul.f32 0.03125, %v224_v19  ;;  %v221_v21 = vpop.xlane.xlu0 %220 }
 0x2a6   :  { %v232_v22 = vmul.f32 0.03125, %v221_v21 }
 0x2a7   :  { %v237_v23 = vsub.f32 %v205_v8, %v233_v20 }
 0x2a8   :  { %v236_v24 = vsub.f32 %v200_v10, %v232_v22  ;;  %v230_v25 = vpop.xlane.xlu1 %229 }
 0x2a9   :  { %v235_v26 = vmul.f32 0.03125, %v230_v25  ;;  %v227_v27 = vpop.xlane.xlu0 %226  ;;  %v241_v28 = vmul.f32 %v237_v23, %v237_v23 }
 0x2aa   :  { %v234_v29 = vmul.f32 0.03125, %v227_v27  ;;  %v240_v30 = vmul.f32 %v236_v24, %v236_v24 }
 0x2ab   :  { %v239_v31 = vsub.f32 %v215_v13, %v235_v26  ;;  %v247_v32 = vsel %vm218_vm1, %v241_v28, 0.0 }
 0x2ac   :  { %v238_v33 = vsub.f32 %v210_v16, %v234_v29  ;;  %248 = vadd.xlane.f32.xlu1 %v247_v32  ;;  %v244_v34 = vsel %vm218_vm1, %v240_v30, 0.0 }
 0x2ad   :  { %245 = vadd.xlane.f32.xlu0 %v244_v34  ;;  %v243_v35 = vmul.f32 %v239_v31, %v239_v31 }
 0x2ae   :  { %v242_v36 = vmul.f32 %v238_v33, %v238_v33 }
 0x2af   :  { %v253_v37 = vsel %vm218_vm1, %v243_v35, 0.0 }
 0x2b0   :  { %254 = vadd.xlane.f32.xlu1 %v253_v37  ;;  %v250_v38 = vsel %vm218_vm1, %v242_v36, 0.0 }
 0x2b1   :  { %251 = vadd.xlane.f32.xlu0 %v250_v38 }
 0x339   :  { %v249_v39 = vpop.xlane.xlu1 %248 }
 0x33a   :  { %v257_v40 = vmul.f32 0.03125, %v249_v39  ;;  %v246_v41 = vpop.xlane.xlu0 %245 }
 0x33b   :  { %v256_v42 = vmul.f32 0.03125, %v246_v41 }
 0x33c   :  { %v261_v43 = vadd.f32 1e-05, %v257_v40 }
 0x33d   :  { %v260_v44 = vadd.f32 1e-05, %v256_v42  ;;  %v255_v45 = vpop.xlane.xlu1 %254 }
 0x33e   :  { %377 = vrsqrt.f32 %v261_v43  ;;  %v259_v46 = vmul.f32 0.03125, %v255_v45  ;;  %v252_v47 = vpop.xlane.xlu0 %251 }
 0x33f   :  { %379 = vrsqrt.f32 %v260_v44  ;;  %v258_v48 = vmul.f32 0.03125, %v252_v47 }
 0x340   :  { %v263_v49 = vadd.f32 1e-05, %v259_v46 }
 0x341   :  { %v262_v50 = vadd.f32 1e-05, %v258_v48 }
 0x342   :  { %381 = vrsqrt.f32 %v263_v49 }
 0x343   :  { %383 = vrsqrt.f32 %v262_v50 }
 0x348   :  { %v378_v51 = vpop.eup %377 }
 0x349   :  { %v380_v53 = vpop.eup %379  ;;  %v269_v54 = vmul.f32 %v378_v51, %v237_v23 }
 0x34a   :  { %v268_v56 = vmul.f32 %v380_v53, %v236_v24 }
 0x34b   :  { %v280_v57 = vmul.f32 %v309_v52, %v269_v54 }
 0x34c   :  { %v382_v58 = vpop.eup %381  ;;  %v279_v59 = vmul.f32 %v309_v52, %v268_v56 }
 0x34d   :  { %v384_v60 = vpop.eup %383  ;;  %v291_v61 = vadd.f32 %v310_v55, %v280_v57  ;;  %v271_v62 = vmul.f32 %v382_v58, %v239_v31 }
 0x34e   :  { %v290_v63 = vadd.f32 %v310_v55, %v279_v59  ;;  %v270_v0 = vmul.f32 %v384_v60, %v238_v33 }
 0x34f   :  { %295 = vst.msk [vmem:[%s539_s7 + $0x8] sm:$0xff] %vm218_vm1, %v291_v61  ;;  %v282_v1 = vmul.f32 %v309_v52, %v271_v62 }
 0x350   :  { %294 = vst.msk [vmem:[%s539_s7] sm:$0xff] %vm218_vm1, %v290_v63  ;;  %v281_v2 = vmul.f32 %v309_v52, %v270_v0 }
 0x351   :  { %v293_v3 = vadd.f32 %v310_v55, %v282_v1 }
 0x352   :  { %v292_v4 = vadd.f32 %v310_v55, %v281_v2 }
 0x353   :  { %297 = vst.msk [vmem:[%s539_s7 + $0x18] sm:$0xff] %vm218_vm1, %v293_v3 }
 0x354   :  { %296 = vst.msk [vmem:[%s539_s7 + $0x10] sm:$0xff] %vm218_vm1, %v292_v4 }

// kernel: context_decoder_forward.9
= control target key start
LH: loop header
LB: loop body
LE: loop exit
PB: predicated region body
PF: predicated region fallthrough
CT: control target
= control target key end

     0   :  { %vm29_vm0 = vcmask 261120   ;;  %s335_s0 = inlined_call_operand.vmem [shape: f32[16,32], index: 0, kind: input, shape index: {}]   ;;  %s336_s1 = inlined_call_operand.vmem [shape: f32[1,32], index: 1, kind: input, shape index: {}]   ;;  %s337_s2 = inlined_call_operand.vmem [shape: f32[1,32], index: 2, kind: input, shape index: {}]   ;;  %s338_s3 = inlined_call_operand.vmem [shape: f32[32,64], index: 3, kind: input, shape index: {}]   ;;  %s339_s4 = inlined_call_operand.vmem [shape: f32[1,64], index: 4, kind: input, shape index: {}]   ;;  %s340_s5 = inlined_call_operand.vmem [shape: f32[1,64], index: 5, kind: input, shape index: {}]   ;;  %s341_s6 = inlined_call_operand.vmem [shape: f32[1,64], index: 6, kind: input, shape index: {}]   ;;  %s342_s7 = inlined_call_operand.hbm [shape: f32[16,64], index: 7, kind: output, shape index: {}]  }
   0x1   :  { %v27_v0 = vld [vmem:[%s335_s0] sm:$0xff]  ;;  %v28_v1 = vld [vmem:[%s335_s0 + $0x8] sm:$0xff] }
   0x2   :  { %12 = vsyncpa [#allocation3], 0  ;;  %v30_v2 = vsel %vm29_vm0, %v27_v0, 0.0  ;;  %v33_v3 = vsel %vm29_vm0, %v28_v1, 0.0  ;;  %v75_v14 = vld [vmem:[%s338_s3] sm:$0xff]  ;;  %v76_v15 = vld [vmem:[%s338_s3 + $0x8] sm:$0xff] }
   0x3   :  { %31 = vadd.xlane.f32.xlu0 %v30_v2  ;;  %v77_v16 = vld [vmem:[%s338_s3 + $0x10] sm:$0xff]  ;;  %v208_v17 = vpack.c.bf16 %v76_v15, %v75_v14  ;;  %v78_v18 = vld [vmem:[%s338_s3 + $0x18] sm:$0xff]  ;;  %v186_v27 = vld [vmem:[%s336_s1] ss:$0 sm:$0xff]  ;;  %s247_s1 = smov [#allocation2]   ;;  %vm167_vm1 = vcmask 523264  }
   0x4   :  { %v212_v19 = vpack.c.bf16 %v78_v18, %v77_v16  ;;  %v187_v29 = vld [vmem:[%s337_s2] ss:$0 sm:$0xff]  ;;  %s175_s15 = sshll.u32 %s247_s1, 4  ;;  %s176_s15 = int_to_ptr.vmem [resolvable:$true] %s175_s15 }
   0x5   :  { %209 = vmatprep.subr.bf16.mxu0 %v208_v17  ;;  %v188_v36 = vld [vmem:[%s339_s4] ss:$0 sm:$0xff]  ;;  %s223_s2 = scalar_lea.vmem %s176_s15, 256  ;;  %p228_p1 = scmp.lt.s32.totalorder %s176_s15, %s176_s15 }
   0x6   :  { %211 = vmatpush3.bf16.msra.mxu0 %v208_v17  ;;  %p224_p0 = scmp.ne.s32.totalorder %s176_s15, %s223_s2  ;;  %p229_p2 = scmp.lt.s32.totalorder %s223_s2, %s223_s2 }
   0x7   :  { %34 = vadd.xlane.f32.xlu0 %v33_v3  ;;  %213 = vmatprep.subr.bf16.mxu0 %v212_v19 }
   0x8   :  { %p230_p3 = por %p229_p2, %p228_p1 }
   0xa   :  { %215 = vmatpush3.bf16.msra.mxu0 %v212_v19  ;;  %p231_p4 = pnand %p230_p3, %p224_p0 }
  0x90   :  { %v32_v4 = vpop.xlane.xlu0 %31 }
  0x91   :  { %v37_v5 = vmul.f32 0.03125, %v32_v4 }
  0x93   :  { %v39_v6 = vsub.f32 %v27_v0, %v37_v5 }
  0x94   :  { %v35_v7 = vpop.xlane.xlu0 %34 }
  0x95   :  { %v38_v8 = vmul.f32 0.03125, %v35_v7  ;;  %v41_v9 = vmul.f32 %v39_v6, %v39_v6 }
  0x97   :  { %v40_v10 = vsub.f32 %v28_v1, %v38_v8  ;;  %v43_v11 = vsel %vm29_vm0, %v41_v9, 0.0 }
  0x98   :  { %44 = vadd.xlane.f32.xlu1 %v43_v11 }
  0x99   :  { %v42_v12 = vmul.f32 %v40_v10, %v40_v10 }
  0x9b   :  { %v46_v13 = vsel %vm29_vm0, %v42_v12, 0.0 }
  0x9c   :  { %47 = vadd.xlane.f32.xlu1 %v46_v13 }
 0x125   :  { %v45_v20 = vpop.xlane.xlu1 %44 }
 0x126   :  { %v49_v21 = vmul.f32 0.03125, %v45_v20 }
 0x128   :  { %v51_v22 = vadd.f32 1e-05, %v49_v21 }
 0x129   :  { %v48_v23 = vpop.xlane.xlu1 %47 }
 0x12a   :  { %219 = vrsqrt.f32 %v51_v22  ;;  %v50_v24 = vmul.f32 0.03125, %v48_v23 }
 0x12c   :  { %v52_v25 = vadd.f32 1e-05, %v50_v24 }
 0x12e   :  { %221 = vrsqrt.f32 %v52_v25 }
 0x134   :  { %v220_v26 = vpop.eup %219 }
 0x135   :  { %v55_v28 = vmul.f32 %v220_v26, %v39_v6 }
 0x137   :  { %v64_v30 = vmul.f32 %v186_v27, %v55_v28 }
 0x138   :  { %v222_v31 = vpop.eup %221 }
 0x139   :  { %v56_v32 = vmul.f32 %v222_v31, %v40_v10  ;;  %v73_v33 = vadd.f32 %v187_v29, %v64_v30 }
 0x13b   :  { %v65_v34 = vmul.f32 %v186_v27, %v56_v32  ;;  %205 = vmatprep.mubr.msk.f32.mxu0 %vm29_vm0, %v73_v33 }
 0x13d   :  { %v74_v35 = vadd.f32 %v187_v29, %v65_v34 }
 0x13f   :  { %206 = vmatmul.mubr.msk.f32.vlgmr.msra.gmra.mrb[0].mxu0 %vm29_vm0, %v74_v35 }
 0x212   :  { %v207_v37 = vpop.f32.mrb[0].mxu0 }
 0x213   :  { %v164_v38 = vadd.f32 %v207_v37, %v188_v36  ;;  %v158_v39 = vpop.f32.mrb[1].mxu0 }
 0x214   :  { %v159_v40 = vadd.f32 %v188_v36, %v158_v39 }
 0x215   :  { %169 = vst.msk [vmem:[#allocation2 + $0x8] sm:$0xff] %vm167_vm1, %v164_v38 }
 0x216   :  { %168 = vst.msk [vmem:[#allocation2] sm:$0xff] %vm167_vm1, %v159_v40 }
 0x217   :  { %234 = shalt.err (!%p231_p4)
}
 0x218   :  { %s235_s4 = scalar_lea.hbm %s342_s7, 256 }
 0x219   :  { %p236_p5 = scmp.ne.s32.totalorder %s342_s7, %s235_s4  ;;  %p239_p6 = scmp.lt.u32.totalorder %s235_s4, %s342_s7 }
 0x21b   :  { %p241_p7 = pnand %p239_p6, %p236_p5 }
 0x21d   :  { %244 = shalt.err (!%p241_p7)
}
 0x21e   :  { %s248_s22 = smov 128   ;;  %s249_s23 = smov 8  }
 0x21f   :  { %181 = dma.vmem_to_hbm [thread:$0]  %s176_s15, 256, %s342_s7, [#allocation3], %s248_s22, %s248_s22, %s249_s23  }
 0x220   :  { %245 = dma.done.wait [#allocation3], 256  }
 0x221   :  { %246 = vsyncadd [#allocation3], 4294967040 }
 0x222   :  { %185 = vsyncpa [#allocation3], 1 }

// kernel: context_decoder_forward.7
= control target key start
LH: loop header
LB: loop body
LE: loop exit
PB: predicated region body
PF: predicated region fallthrough
CT: control target
= control target key end

     0   :  { %s3813_s0 = inlined_call_operand.vmem [shape: f32[2,8,32], index: 0, kind: input, shape index: {}]   ;;  %s3814_s1 = inlined_call_operand.vmem [shape: f32[2,16,32], index: 1, kind: input, shape index: {}]   ;;  %s3815_s2 = inlined_call_operand.vmem [shape: f32[1,32], index: 2, kind: input, shape index: {}]   ;;  %s3816_s3 = inlined_call_operand.vmem [shape: f32[1,32], index: 3, kind: input, shape index: {}]   ;;  %s3817_s4 = inlined_call_operand.vmem [shape: f32[1,32], index: 4, kind: input, shape index: {}]   ;;  %s3818_s5 = inlined_call_operand.vmem [shape: f32[1,32], index: 5, kind: input, shape index: {}]   ;;  %s3819_s6 = inlined_call_operand.vmem [shape: f32[1,32], index: 6, kind: input, shape index: {}]   ;;  %s3820_s7 = inlined_call_operand.vmem [shape: f32[1,32], index: 7, kind: input, shape index: {}]   ;;  %s3821_s8 = inlined_call_operand.vmem [shape: f32[32,96], index: 8, kind: input, shape index: {}]   ;;  %s3822_s9 = inlined_call_operand.vmem [shape: f32[32,32], index: 9, kind: input, shape index: {}]   ;;  %s3823_s10 = inlined_call_operand.vmem [shape: f32[1,32], index: 10, kind: input, shape index: {}]   ;;  %s3824_s11 = inlined_call_operand.vmem [shape: f32[32,32], index: 11, kind: input, shape index: {}]   ;;  %s3825_s12 = inlined_call_operand.vmem [shape: f32[32,64], index: 12, kind: input, shape index: {}]   ;;  %s3826_s13 = inlined_call_operand.vmem [shape: f32[32,32], index: 13, kind: input, shape index: {}]   ;;  %s3827_s14 = inlined_call_operand.vmem [shape: f32[1,32], index: 14, kind: input, shape index: {}]   ;;  %s3828_s15 = inlined_call_operand.vmem [shape: f32[32,128], index: 15, kind: input, shape index: {}]   ;;  %s3829_s16 = inlined_call_operand.vmem [shape: f32[1,128], index: 16, kind: input, shape index: {}]   ;;  %s3830_s17 = inlined_call_operand.vmem [shape: f32[128,32], index: 17, kind: input, shape index: {}]   ;;  %s3831_s18 = inlined_call_operand.vmem [shape: f32[1,32], index: 18, kind: input, shape index: {}]   ;;  %s3832_s19 = inlined_call_operand.vmem [shape: f32[2,8,32], index: 19, kind: output, shape index: {}]  }
   0x1   :  { %3841 = sst [smem:[#allocation3_spill]] %s3813_s0  ;;  %s3418_s0 = smov 0  }
   0x2   :  { %3842 = sst [smem:[#allocation4_spill]] %s3814_s1 }
   0x3   :  { %3843 = sst [smem:[#allocation5_spill]] %s3815_s2 }
   0x4   :  { %3844 = sst [smem:[#allocation6_spill]] %s3816_s3 }
   0x5 LB: > { %s2761_s30 = sadd.s32 4294967295, %s3299_s0   ;;  %p2765_p0 = scmp.ge.s32.totalorder %s3299_s0, 1  ;;  %s3299_s0 = sphi %s3418_s0, %s29_s0  }
   0x6   : > { %p546_p1 = scmp.lt.s32.totalorder %s3299_s0, 3 }
   0x8   : > { %p547_p2 = pnand %p2765_p0, %p546_p1 }
   0x9   : > { %p605_p3 = scmp.lt.s32.totalorder (!%p547_p2), %s2761_s30, 1  ;;  %vm621_vm0 = vcmask (!%p547_p2), 261120   ;;  %s3845_s22 = sld [smem:[#allocation3_spill]] (!%p547_p2)  ;;  %v652_v7 = vld [vmem:[%s3821_s8] sm:$0xff] (!%p547_p2)  ;;  %v653_v8 = vld [vmem:[%s3821_s8 + $0x8] sm:$0xff] (!%p547_p2)  ;;  %v654_v9 = vld [vmem:[%s3821_s8 + $0x10] sm:$0xff] (!%p547_p2) }
   0xa   : > { %550 = sbr.rel (%p547_p2) target bundleno = 5315 (0x14c3), region = 96  ;;  %v3301_v10 = vmov (!%p547_p2), 0.0|0.0   ;;  %v3104_v11 = vpack.c.bf16 (!%p547_p2), %v653_v8, %v652_v7  ;;  %v655_v12 = vld [vmem:[%s3821_s8 + $0x18] sm:$0xff] (!%p547_p2)  ;;  %vm3302_vm1 = vmmov (!%p547_p2), 0   ;;  %v3303_v13 = vmov (!%p547_p2), 0.0   ;;  %s3847_s24 = sld [smem:[#allocation6_spill]] (!%p547_p2) }
   0xb   : > { %3103 = vmatprep.subr.bf16.mxu1 (!%p547_p2), %v3301_v10  ;;  %2914 = vmatprep.mubr.msk.f32.mxu1 (!%p547_p2), %vm3302_vm1, %v3303_v13  ;;  %v3107_v14 = vpack.c.bf16 (!%p547_p2), %v655_v12, %v654_v9  ;;  %s3304_s25 = smov (!%p547_p2), 120   ;;  %s3305_s3 = smov (!%p547_p2), 96   ;;  %vm732_vm2 = vcmask (!%p547_p2), 64512   ;;  %vm1066_vm3 = vcmask (!%p547_p2), 130112   ;;  %vm1238_vm4 = vcmask (!%p547_p2), 195712  }
   0xc   : > { %2927 = vmatprep.subr.mxu0 (!%p547_p2), %v3303_v13  ;;  %2929 = vmatprep.mubr.msk.f32.mxu0 (!%p547_p2), %vm3302_vm1, %v3303_v13  ;;  %s3306_s26 = smov (!%p547_p2), 88   ;;  %s3835_s27 = smov (!%p547_p2), 80   ;;  %vm1410_vm5 = vcmask (!%p547_p2), 261312   ;;  %vm3611_vm6 = vmpackc.low (!%p547_p2), %vm732_vm2, %vm732_vm2  ;;  %vm1770_vm7 = vcmask (!%p547_p2), 130048  }
   0xd   : > { %3105 = vmatpush3.bf16.msra.mxu1 (!%p547_p2), %v3104_v11  ;;  %s3308_s28 = smov (!%p547_p2), 112   ;;  %s3834_s29 = smov (!%p547_p2), 72  }
   0xe   : > { %3106 = vmatprep.subr.bf16.mxu1 (!%p547_p2), %v3301_v10  ;;  %s3839_s21 = smov (!%p547_p2), 104   ;;  %s3311_s1 = smov (!%p547_p2), 64  }
   0xf   : > { %s3314_s23 = smov (!%p547_p2), 56  }
  0x10   : > { %v2771_v21 = vld [vmem:[%s3847_s24] ss:$0 sm:$0xff] (!%p547_p2)  ;;  %s3837_s24 = smov (!%p547_p2), 8  }
  0x11   : > { %s3859_s30 = smov (!%p605_p3, %s2761_s30), 1  ;;  %3108 = vmatpush3.bf16.msra.mxu1 %v3107_v14 }
  0x12   : > { %s3833_s20 = sshll.u32 %s3859_s30, 3  ;;  %2917 = vmatprep.subr.mxu1 %v3303_v13 }
  0x13   : > { %s608_s2 = scalar_lea.vmem %s3845_s22, %s3833_s20  ;;  %s3846_s22 = sld [smem:[#allocation5_spill]] }
  0x14   : > { %v3434_v0 = vld [vmem:[%s608_s2] sm:$0xff]  ;;  %s3313_s2 = smov 40   ;;  %s3836_s20 = smov 24  }
  0x15   : > { %v622_v1 = vsel %vm621_vm0, %v3434_v0, 0.0 }
  0x16   : > { %623 = vadd.xlane.f32.xlu0 %v622_v1 }
  0x19   : > { %v2770_v19 = vld [vmem:[%s3846_s22] ss:$0 sm:$0xff]  ;;  %s3312_s22 = smov 48  }
  0xa3   : > { %v624_v2 = vpop.xlane.xlu0 %623 }
  0xa4   : > { %v626_v3 = vmul.f32 0.03125, %v624_v2 }
  0xa6   : > { %v627_v4 = vsub.f32 %v3434_v0, %v626_v3 }
  0xa8   : > { %v628_v5 = vmul.f32 %v627_v4, %v627_v4 }
  0xaa   : > { %v629_v6 = vsel %vm621_vm0, %v628_v5, 0.0 }
  0xab   : > { %630 = vadd.xlane.f32.xlu0 %v629_v6 }
 0x138   : > { %v631_v15 = vpop.xlane.xlu0 %630 }
 0x139   : > { %v632_v16 = vmul.f32 0.03125, %v631_v15 }
 0x13b   : > { %v633_v17 = vadd.f32 1e-05, %v632_v16 }
 0x13d   : > { %3253 = vrsqrt.f32 %v633_v17 }
 0x147   : > { %v3254_v18 = vpop.eup %3253 }
 0x148   : > { %v635_v20 = vmul.f32 %v3254_v18, %v627_v4 }
 0x14a   : > { %v643_v22 = vmul.f32 %v2770_v19, %v635_v20 }
 0x14c   : > { %v651_v23 = vadd.f32 %v2771_v21, %v643_v22 }
 0x14e   : > { %2915 = vmatmul.mubr.msk.f32.vlgmr.msra.gmra.mrb[0].mxu1 %vm621_vm0, %v651_v23 }
 0x14f   : > { %2919 = vmatprep.mubr.msk.f32.mxu1 %vm3302_vm1, %v3303_v13 }
 0x221   : > { %v3469_v24 = vpop.f32.mrb[0].mxu1 }
 0x222   : > { %896 = vrot.lane.b32.xlu0 %v3469_v24, %s3304_s25  ;;  %730 = vrot.lane.b32.xlu1 %v3469_v24, %s3305_s3  ;;  %v2916_v25 = vpop.f32.mrb[1].mxu1 }
 0x226   : > { %898 = vrot.lane.b32.xlu1 %v3469_v24, %s3306_s26 }
 0x22a   : > { %1070 = vrot.lane.b32.xlu1 %v3469_v24, %s3835_s27 }
 0x22e   : > { %1068 = vrot.lane.b32.xlu1 %v3469_v24, %s3308_s28 }
 0x232   : > { %1242 = vrot.lane.b32.xlu1 %v3469_v24, %s3834_s29 }
 0x236   : > { %1240 = vrot.lane.b32.xlu1 %v3469_v24, %s3839_s21 }
 0x294   : > { %v731_v26 = vpop.permute.xlu1 %730  ;;  %v897_v28 = vpop.permute.xlu0 %896 }
 0x295   : > { %2918 = vmatpush3.xpose.msk.msra.mxu1 %vm732_vm2, %v731_v26  ;;  %v1413_v26 = vld [vmem:[%s3822_s9] sm:$0xff] }
 0x296   : > { %2922 = vmatprep.subr.mxu1 %v3303_v13 }
 0x298   : > { %2920 = vmatmul.mubr.msk.f32.vlgmr.msra.gmra.mrb[2].mxu1 %vm732_vm2, %v3469_v24  ;;  %v899_v27 = vpop.permute.xlu1 %898 }
 0x299   : > { %2928 = vmatpush3.xpose.msk.msra.mxu0 %vm732_vm2, %v899_v27  ;;  %2924 = vmatprep.mubr.msk.f32.mxu1 %vm3302_vm1, %v3303_v13  ;;  %v1414_v27 = vld [vmem:[%s3822_s9 + $0x8] sm:$0xff] }
 0x29a   : > { %2937 = vmatprep.subr.mxu0 %v3303_v13 }
 0x29c   : > { %2930 = vmatmul.mubr.msk.f32.vlgmr.msra.gmra.mrb[0].mxu0 %vm732_vm2, %v897_v28  ;;  %v1071_v29 = vpop.permute.xlu1 %1070  ;;  %v3110_v28 = vpack.c.bf16 %v1414_v27, %v1413_v26 }
 0x29d   : > { %2938 = vmatpush3.xpose.msk.msra.mxu0 %vm732_vm2, %v1071_v29  ;;  %2939 = vmatprep.mubr.msk.f32.mxu0 %vm3302_vm1, %v3303_v13  ;;  %v1415_v29 = vld [vmem:[%s3822_s9 + $0x10] sm:$0xff] }
 0x29e   : > { %2947 = vmatprep.subr.mxu0 %v3303_v13 }
 0x2a0   : > { %v1069_v30 = vpop.permute.xlu1 %1068 }
 0x2a1   : > { %2940 = vmatmul.mubr.msk.f32.vlgmr.msra.gmra.mrb[2].mxu0 %vm732_vm2, %v1069_v30  ;;  %v1416_v30 = vld [vmem:[%s3822_s9 + $0x18] sm:$0xff] }
 0x2a2   : > { %2949 = vmatprep.mubr.msk.f32.mxu0 %vm3302_vm1, %v3303_v13 }
 0x2a4   : > { %v1243_v31 = vpop.permute.xlu1 %1242 }
 0x2a5   : > { %2948 = vmatpush3.xpose.msk.msra.mxu0 %vm732_vm2, %v1243_v31  ;;  %v3113_v31 = vpack.c.bf16 %v1416_v30, %v1415_v29 }
 0x2a8   : > { %v1241_v32 = vpop.permute.xlu1 %1240 }
 0x2a9   : > { %2950 = vmatmul.mubr.msk.f32.vlgmr.msra.gmra.mrb[4].mxu0 %vm732_vm2, %v1241_v32 }
 0x36b   : > { %v803_v33 = vpop.f32.mrb[2].mxu1 }
 0x36c   : > { %v807_v34 = vmul.f32 0.35355338, %v803_v33  ;;  %v2921_v35 = vpop.f32.mrb[3].mxu1 }
 0x36e   : > { %v808_v36 = vsel %vm732_vm2, %v807_v34, -inf }
 0x36f   : > { %v970_v37 = vpop.f32.mrb[0].mxu0  ;;  %809 = vmax.xlane.f32.xlu1 %v808_v36 }
 0x370   : > { %v974_v38 = vmul.f32 0.35355338, %v970_v37  ;;  %v2931_v39 = vpop.f32.mrb[1].mxu0 }
 0x372   : > { %v975_v40 = vsel %vm732_vm2, %v974_v38, -inf }
 0x373   : > { %976 = vmax.xlane.f32.xlu0 %v975_v40 }
 0x374   : > { %v1142_v41 = vpop.f32.mrb[2].mxu0 }
 0x375   : > { %v1146_v42 = vmul.f32 0.35355338, %v1142_v41  ;;  %v2941_v43 = vpop.f32.mrb[3].mxu0 }
 0x376   : > { %v2786_v43 = vld [vmem:[%s3823_s10] ss:$0 sm:$0xff] }
 0x377   : > { %v1147_v44 = vsel %vm732_vm2, %v1146_v42, -inf }
 0x378   : > { %1148 = vmax.xlane.f32.xlu1 %v1147_v44 }
 0x37c   : > { %v1314_v45 = vpop.f32.mrb[4].mxu0 }
 0x37d   : > { %v1318_v46 = vmul.f32 0.35355338, %v1314_v45  ;;  %v2951_v47 = vpop.f32.mrb[5].mxu0 }
 0x37f   : > { %v1319_v48 = vsel %vm732_vm2, %v1318_v46, -inf }
 0x380   : > { %1320 = vmax.xlane.f32.xlu0 %v1319_v48  ;;  %v1605_v48 = vld [vmem:[%s3825_s12] sm:$0xff] }
 0x389   : > { %819 = vrot.lane.b32.xlu1 %v3469_v24, %s3311_s1  ;;  %s3838_s1 = smov 16  }
 0x3fc   : > { %v810_v49 = vpop.xlane.xlu1 %809 }
 0x3fd   : > { %v811_v50 = vsub.f32 %v807_v34, %v810_v49  ;;  %v1606_v49 = vld [vmem:[%s3825_s12 + $0x8] sm:$0xff] }
 0x3ff   : > { %v812_v51 = vmul.f32 1.442695, %v811_v50  ;;  %v3121_v50 = vpack.c.bf16 %v1606_v49, %v1605_v48 }
 0x400   : > { %v977_v52 = vpop.xlane.xlu0 %976 }
 0x401   : > { %3255 = vpow2.f32 %v812_v51  ;;  %v978_v53 = vsub.f32 %v974_v38, %v977_v52  ;;  %3122 = vmatprep.subr.bf16.mxu0 %v3121_v50 }
 0x402   : > { %3124 = vmatpush3.bf16.msra.mxu0 %v3121_v50 }
 0x403   : > { %v979_v54 = vmul.f32 1.442695, %v978_v53 }
 0x405   : > { %3257 = vpow2.f32 %v979_v54  ;;  %v1149_v55 = vpop.xlane.xlu1 %1148 }
 0x406   : > { %v1150_v56 = vsub.f32 %v1146_v42, %v1149_v55  ;;  %v1607_v55 = vld [vmem:[%s3825_s12 + $0x10] sm:$0xff] }
 0x408   : > { %v1151_v57 = vmul.f32 1.442695, %v1150_v56  ;;  %v1608_v56 = vld [vmem:[%s3825_s12 + $0x18] sm:$0xff] }
 0x409   : > { %v820_v58 = vpop.permute.xlu1 %819 }
 0x40a   : > { %3259 = vpow2.f32 %v1151_v57  ;;  %2923 = vmatpush3.msra.mxu1 %v820_v58  ;;  %v3125_v57 = vpack.c.bf16 %v1608_v56, %v1607_v55 }
 0x40b   : > { %v3256_v59 = vpop.eup %3255  ;;  %2932 = vmatprep.subr.mxu1 %v3303_v13 }
 0x40c   : > { %v814_v60 = vsel %vm732_vm2, %v3256_v59, 0.0  ;;  %3126 = vmatprep.subr.bf16.mxu0 %v3125_v57 }
 0x40d   : > { %v1321_v61 = vpop.xlane.xlu0 %1320  ;;  %815 = vadd.xlane.f32.xlu1 %v814_v60  ;;  %3128 = vmatpush3.bf16.msra.mxu0 %v3125_v57  ;;  %v1528_v60 = vld [vmem:[%s3824_s11] sm:$0xff] }
 0x40e   : > { %v1322_v62 = vsub.f32 %v1318_v46, %v1321_v61  ;;  %3133 = vmatprep.subr.bf16.mxu0 %v3301_v10  ;;  %v1529_v61 = vld [vmem:[%s3824_s11 + $0x8] sm:$0xff] }
 0x40f   : > { %v3258_v63 = vpop.eup %3257 }
 0x410   : > { %v1323_v1 = vmul.f32 1.442695, %v1322_v62  ;;  %v981_v2 = vsel %vm732_vm2, %v3258_v63, 0.0  ;;  %v3116_v62 = vpack.c.bf16 %v1529_v61, %v1528_v60 }
 0x411   : > { %982 = vadd.xlane.f32.xlu0 %v981_v2 }
 0x412   : > { %3261 = vpow2.f32 %v1323_v1  ;;  %v1531_v1 = vld [vmem:[%s3824_s11 + $0x18] sm:$0xff] }
 0x414   : > { %v3260_v3 = vpop.eup %3259 }
 0x415   : > { %v1153_v4 = vsel %vm732_vm2, %v3260_v3, 0.0 }
 0x416   : > { %1154 = vadd.xlane.f32.xlu1 %v1153_v4 }
 0x41c   : > { %v3262_v5 = vpop.eup %3261 }
 0x41d   : > { %v1325_v6 = vsel %vm732_vm2, %v3262_v5, 0.0 }
 0x41e   : > { %1326 = vadd.xlane.f32.xlu0 %v1325_v6 }
 0x427   : > { %1158 = vrot.lane.b32.xlu1 %v3469_v24, %s3312_s22  ;;  %s3857_s22 = sshll.u32 %s3859_s30, 3 }
 0x42b   : > { %1330 = vrot.lane.b32.xlu1 %v3469_v24, %s3313_s2  ;;  %s3855_s2 = smov 8  }
 0x434   : > { %986 = vrot.lane.b32.xlu0 %v3469_v24, %s3314_s23 }
 0x49a   : > { %v816_v7 = vpop.xlane.xlu1 %815 }
 0x49b   : > { %3263 = vrcp.f32 %v816_v7  ;;  %v2787_v7 = vld [vmem:[%s3817_s4] ss:$0 sm:$0xff] }
 0x49e   : > { %v983_v8 = vpop.xlane.xlu0 %982 }
 0x49f   : > { %3265 = vrcp.f32 %v983_v8 }
 0x4a3   : > { %v1155_v9 = vpop.xlane.xlu1 %1154 }
 0x4a4   : > { %3267 = vrcp.f32 %v1155_v9  ;;  %v2788_v9 = vld [vmem:[%s3818_s5] ss:$0 sm:$0xff] }
 0x4a5   : > { %v3264_v11 = vpop.eup %3263 }
 0x4a6   : > { %v818_v12 = vmul.f32 %v3264_v11, %v3256_v59 }
 0x4a7   : > { %v1159_v17 = vpop.permute.xlu1 %1158 }
 0x4a8   : > { %2925 = vmatmul.mubr.msk.f32.vlgmr.msra.gmra.mrb[4].mxu1 %vm732_vm2, %v818_v12 }
 0x4a9   : > { %2934 = vmatprep.mubr.msk.f32.mxu1 %vm3302_vm1, %v3303_v13  ;;  %v3266_v15 = vpop.eup %3265 }
 0x4aa   : > { %v985_v16 = vmul.f32 %v3266_v15, %v3258_v63  ;;  %v1530_v63 = vld [vmem:[%s3824_s11 + $0x10] sm:$0xff] }
 0x4ab   : > { %v1327_v14 = vpop.xlane.xlu0 %1326  ;;  %v1331_v21 = vpop.permute.xlu1 %1330  ;;  %v3119_v2 = vpack.c.bf16 %v1531_v1, %v1530_v63 }
 0x4ac   : > { %3269 = vrcp.f32 %v1327_v14 }
 0x4ae   : > { %v3268_v19 = vpop.eup %3267 }
 0x4af   : > { %v987_v18 = vpop.permute.xlu0 %986  ;;  %v1157_v20 = vmul.f32 %v3268_v19, %v3260_v3 }
 0x4b0   : > { %2933 = vmatpush3.msra.mxu1 %v987_v18 }
 0x4b1   : > { %2935 = vmatmul.mubr.msk.f32.vlgmr.msra.gmra.mrb[6].mxu1 %vm732_vm2, %v985_v16  ;;  %2942 = vmatprep.subr.mxu1 %v3303_v13 }
 0x4b2   : > { %2943 = vmatpush3.msra.mxu1 %v1159_v17  ;;  %2944 = vmatprep.mubr.msk.f32.mxu1 %vm3302_vm1, %v3303_v13 }
 0x4b3   : > { %2952 = vmatprep.subr.mxu1 %v3303_v13 }
 0x4b5   : > { %2945 = vmatmul.mubr.msk.f32.vlgmr.msra.gmra.mrb[8].mxu1 %vm732_vm2, %v1157_v20 }
 0x4b6   : > { %v3270_v22 = vpop.eup %3269  ;;  %2953 = vmatpush3.msra.mxu1 %v1331_v21  ;;  %2954 = vmatprep.mubr.msk.f32.mxu1 %vm3302_vm1, %v3303_v13 }
 0x4b7   : > { %v1329_v23 = vmul.f32 %v3270_v22, %v3262_v5  ;;  %3109 = vmatprep.subr.bf16.mxu1 %v3301_v10 }
 0x4b9   : > { %2955 = vmatmul.mubr.msk.f32.vlgmr.msra.gmra.mrb[10].mxu1 %vm732_vm2, %v1329_v23 }
 0x4ba   : > { %2965 = vmatprep.mubr.msk.f32.mxu1 %vm3302_vm1, %v3303_v13  ;;  %3111 = vmatpush3.bf16.msra.mxu1 %v3110_v28 }
 0x4bb   : > { %3112 = vmatprep.subr.bf16.mxu1 %v3301_v10 }
 0x4be   : > { %3114 = vmatpush3.bf16.msra.mxu1 %v3113_v31 }
 0x4bf   : > { %3115 = vmatprep.subr.bf16.mxu1 %v3301_v10 }
 0x57b   : > { %v891_v24 = vpop.f32.mrb[4].mxu1 }
 0x57c   : > { %895 = vst.msk [vmem:[#allocation2] sm:$0xff] %vm732_vm2, %v891_v24  ;;  %v2926_v25 = vpop.f32.mrb[5].mxu1 }
 0x584   : > { %v1058_v32 = vpop.f32.mrb[6].mxu1 }
 0x585   : > { %1063 = vrot.lane.b32.xlu0 %v1058_v32, %s3837_s24  ;;  %v2936_v33 = vpop.f32.mrb[7].mxu1 }
 0x588   : > { %v1230_v34 = vpop.f32.mrb[8].mxu1 }
 0x589   : > { %1235 = vrot.lane.b32.xlu1 %v1230_v34, %s3838_s1  ;;  %v2946_v35 = vpop.f32.mrb[9].mxu1  ;;  %s3848_s1 = sld [smem:[#allocation4_spill]] }
 0x58c   : > { %v1402_v36 = vpop.f32.mrb[10].mxu1 }
 0x58d   : > { %1407 = vrot.lane.b32.xlu0 %v1402_v36, %s3836_s20  ;;  %v2956_v37 = vpop.f32.mrb[11].mxu1  ;;  %s2817_s20 = sshll.u32 %s3859_s30, 4 }
 0x58f   : > { %s613_s21 = scalar_lea.vmem %s3848_s1, %s2817_s20 }
 0x590   : > { %v619_v58 = vld [vmem:[%s613_s21] sm:$0xff]  ;;  %v620_v59 = vld [vmem:[%s613_s21 + $0x8] sm:$0xff] }
 0x591   : > { %2987 = vmatprep.mubr.msk.f32.mxu0 %vm621_vm0, %v619_v58 }
 0x592   : > { %2988 = vmatmul.mubr.msk.f32.vlgmr.msra.gmra.mrb[6].mxu0 %vm621_vm0, %v620_v59 }
 0x593   : > { %3001 = vmatprep.mubr.msk.f32.mxu0 %vm3302_vm1, %v3303_v13 }
 0x5f7   : > { %v1064_v38 = vpop.permute.xlu0 %1063 }
 0x5f8   : > { %1067 = vst.msk [vmem:[#allocation2] sm:$0xff] %vm1066_vm3, %v1064_v38 }
 0x5fb   : > { %v1236_v39 = vpop.permute.xlu1 %1235 }
 0x5fc   : > { %1239 = vst.msk [vmem:[#allocation2] sm:$0xff] %vm1238_vm4, %v1236_v39 }
 0x5ff   : > { %v1408_v40 = vpop.permute.xlu0 %1407 }
 0x600   : > { %1411 = vst.msk [vmem:[#allocation2] sm:$0xff] %vm1410_vm5, %v1408_v40 }
 0x607   : > { %v1412_v41 = vld [vmem:[#allocation2] sm:$0xff] }
 0x608   : > { %2966 = vmatmul.mubr.msk.f32.vlgmr.msra.gmra.mrb[12].mxu1 %vm621_vm0, %v1412_v41 }
 0x609   : > { %2976 = vmatprep.mubr.msk.f32.mxu1 %vm3302_vm1, %v3303_v13  ;;  %3117 = vmatpush3.bf16.msra.mxu1 %v3116_v62 }
 0x60a   : > { %3118 = vmatprep.subr.bf16.mxu1 %v3301_v10 }
 0x60d   : > { %3120 = vmatpush3.bf16.msra.mxu1 %v3119_v2 }
 0x60e   : > { %3129 = vmatprep.subr.bf16.mxu1 %v3301_v10 }
 0x665   : > { %v2989_v14 = vpop.f32.mrb[6].mxu0 }
 0x666   : > { %v1681_v15 = vpop.f32.mrb[7].mxu0 }
 0x667   : > { %v3615_v17 = vpack.i.bf16 %v2989_v14, %v1681_v15  ;;  %v3130_v18 = vpack.c.bf16 %v2989_v14, %v1681_v15 }
 0x6db   : > { %v1486_v42 = vpop.f32.mrb[12].mxu1 }
 0x6dc   : > { %v1490_v44 = vadd.f32 %v1486_v42, %v3434_v0  ;;  %v2967_v45 = vpop.f32.mrb[13].mxu1 }
 0x6de   : > { %v3559_v46 = vadd.f32 %v2786_v43, %v1490_v44 }
 0x6e0   : > { %v1499_v47 = vsel %vm621_vm0, %v3559_v46, 0.0 }
 0x6e1   : > { %1500 = vadd.xlane.f32.xlu1 %v1499_v47 }
 0x76e   : > { %v1501_v0 = vpop.xlane.xlu1 %1500 }
 0x76f   : > { %v1502_v51 = vmul.f32 0.03125, %v1501_v0 }
 0x771   : > { %v1503_v52 = vsub.f32 %v3559_v46, %v1502_v51 }
 0x773   : > { %v1504_v53 = vmul.f32 %v1503_v52, %v1503_v52 }
 0x775   : > { %v1505_v54 = vsel %vm621_vm0, %v1504_v53, 0.0 }
 0x776   : > { %1506 = vadd.xlane.f32.xlu0 %v1505_v54 }
 0x78c   : > { %3219 = vrot.lane.b32.xlu0 %v3615_v17, %s3304_s25 }
 0x803   : > { %v1507_v3 = vpop.xlane.xlu0 %1506 }
 0x804   : > { %v1508_v4 = vmul.f32 0.03125, %v1507_v3 }
 0x806   : > { %v1509_v5 = vadd.f32 1e-05, %v1508_v4 }
 0x807   : > { %v3220_v19 = vpop.permute.xlu0 %3219 }
 0x808   : > { %3271 = vrsqrt.f32 %v1509_v5  ;;  %v3222_v20 = vunpack.i.h.bf16 %v3220_v19  ;;  %v3221_v21 = vunpack.i.l.bf16 %v3220_v19 }
 0x80a   : > { %v3137_v22 = vpack.c.bf16 %v3222_v20, %v3221_v21 }
 0x812   : > { %v3272_v6 = vpop.eup %3271 }
 0x813   : > { %v1511_v8 = vmul.f32 %v3272_v6, %v1503_v52 }
 0x815   : > { %v1519_v11 = vmul.f32 %v2787_v7, %v1511_v8 }
 0x817   : > { %v1527_v12 = vadd.f32 %v2788_v9, %v1519_v11 }
 0x819   : > { %2977 = vmatmul.mubr.msk.f32.vlgmr.msra.gmra.mrb[14].mxu1 %vm621_vm0, %v1527_v12 }
 0x81a   : > { %2994 = vmatprep.mubr.msk.f32.mxu1 %vm3302_vm1, %v3303_v13  ;;  %3132 = vmatpush3.bf16.xpose.msk.msra.mxu1 %vm3611_vm6, %v3130_v18 }
 0x81b   : > { %3136 = vmatprep.subr.bf16.mxu1 %v3301_v10 }
 0x8ec   : > { %v3622_v23 = vpop.f32.mrb[14].mxu1 }
 0x8ed   : > { %1862 = vrot.lane.b32.xlu1 %v3622_v23, %s3304_s25  ;;  %v2978_v24 = vpop.f32.mrb[15].mxu1  ;;  %2995 = vmatmul.mubr.msk.f32.vlgmr.msra.gmra.mrb[16].mxu1 %vm732_vm2, %v3622_v23  ;;  %s3851_s25 = smov 104  }
 0x8ee   : > { %3139 = vmatpush3.bf16.xpose.msk.msra.mxu1 %vm3611_vm6, %v3137_v22  ;;  %3008 = vmatprep.mubr.msk.f32.mxu1 %vm3302_vm1, %v3303_v13 }
 0x8ef   : > { %3147 = vmatprep.subr.bf16.mxu1 %v3301_v10 }
 0x95f   : > { %v1863_v25 = vpop.permute.xlu1 %1862 }
 0x960   : > { %3009 = vmatmul.mubr.msk.f32.vlgmr.msra.gmra.mrb[18].mxu1 %vm732_vm2, %v1863_v25 }
 0x961   : > { %3029 = vmatprep.mubr.msk.f32.mxu1 %vm3302_vm1, %v3303_v13 }
 0x9c0   : > { %v1765_v26 = vpop.f32.mrb[16].mxu1 }
 0x9c1   : > { %v1769_v27 = vmul.f32 0.35355338, %v1765_v26  ;;  %v2996_v28 = vpop.f32.mrb[17].mxu1 }
 0x9c3   : > { %v1771_v29 = vsel %vm1770_vm7, %v1769_v27, -inf }
 0x9c4   : > { %1772 = vmax.xlane.f32.xlu1 %v1771_v29 }
 0x9d5   : > { %3229 = vrot.lane.b32.xlu1 %v3615_v17, %s3306_s26  ;;  %s3853_s26 = smov 72  }
 0xa33   : > { %v1940_v30 = vpop.f32.mrb[18].mxu1 }
 0xa34   : > { %v1944_v31 = vmul.f32 0.35355338, %v1940_v30  ;;  %v3010_v32 = vpop.f32.mrb[19].mxu1 }
 0xa36   : > { %v1945_v33 = vsel %vm1770_vm7, %v1944_v31, -inf }
 0xa37   : > { %1946 = vmax.xlane.f32.xlu0 %v1945_v33 }
 0xa51   : > { %v1773_v34 = vpop.xlane.xlu1 %1772 }
 0xa52   : > { %v1774_v35 = vsub.f32 %v1769_v27, %v1773_v34 }
 0xa54   : > { %v1775_v36 = vmul.f32 1.442695, %v1774_v35 }
 0xa55   : > { %v3230_v49 = vpop.permute.xlu1 %3229 }
 0xa56   : > { %3273 = vpow2.f32 %v1775_v36  ;;  %v3232_v0 = vunpack.i.h.bf16 %v3230_v49  ;;  %v3231_v51 = vunpack.i.l.bf16 %v3230_v49  ;;  %v2398_v49 = vld [vmem:[%s3826_s13 + $0x8] sm:$0xff] }
 0xa58   : > { %v3141_v54 = vpack.c.bf16 %v3232_v0, %v3231_v51  ;;  %v2399_v0 = vld [vmem:[%s3826_s13 + $0x10] sm:$0xff]  ;;  %v2400_v51 = vld [vmem:[%s3826_s13 + $0x18] sm:$0xff] }
 0xa60   : > { %v3274_v37 = vpop.eup %3273 }
 0xa61   : > { %v1777_v38 = vsel %vm1770_vm7, %v3274_v37, 0.0 }
 0xa62   : > { %1778 = vadd.xlane.f32.xlu0 %v1777_v38 }
 0xa78   : > { %3224 = vrot.lane.b32.xlu0 %v3615_v17, %s3305_s3  ;;  %s3852_s3 = smov 80  }
 0xa7c   : > { %2040 = vrot.lane.b32.xlu0 %v3622_v23, %s3308_s28 }
 0xac4   : > { %v1947_v39 = vpop.xlane.xlu0 %1946 }
 0xac5   : > { %v1948_v40 = vsub.f32 %v1944_v31, %v1947_v39 }
 0xac7   : > { %v1949_v41 = vmul.f32 1.442695, %v1948_v40 }
 0xac9   : > { %3275 = vpow2.f32 %v1949_v41 }
 0xad3   : > { %v3276_v42 = vpop.eup %3275 }
 0xad4   : > { %v1951_v43 = vsel %vm1770_vm7, %v3276_v42, 0.0 }
 0xad5   : > { %1952 = vadd.xlane.f32.xlu1 %v1951_v43 }
 0xae6   : > { %3234 = vrot.lane.b32.xlu1 %v3615_v17, %s3308_s28  ;;  %s3854_s28 = smov 16  }
 0xaef   : > { %v1779_v44 = vpop.xlane.xlu0 %1778 }
 0xaf0   : > { %3277 = vrcp.f32 %v1779_v44 }
 0xaf3   : > { %v3225_v45 = vpop.permute.xlu0 %3224 }
 0xaf4   : > { %v3227_v47 = vunpack.i.h.bf16 %v3225_v45  ;;  %v3226_v48 = vunpack.i.l.bf16 %v3225_v45 }
 0xaf6   : > { %v3134_v50 = vpack.c.bf16 %v3227_v47, %v3226_v48  ;;  %v2397_v48 = vld [vmem:[%s3826_s13] sm:$0xff] }
 0xaf7   : > { %v2041_v62 = vpop.permute.xlu0 %2040 }
 0xaf8   : > { %3135 = vmatpush3.bf16.msra.mxu0 %v3134_v50  ;;  %v3158_v50 = vpack.c.bf16 %v2398_v49, %v2397_v48 }
 0xaf9   : > { %3140 = vmatprep.subr.bf16.mxu0 %v3301_v10 }
 0xafa   : > { %v3278_v52 = vpop.eup %3277 }
 0xafb   : > { %v1781_v53 = vmul.f32 %v3278_v52, %v3274_v37  ;;  %v3161_v52 = vpack.c.bf16 %v2400_v51, %v2399_v0 }
 0xafd   : > { %3002 = vmatmul.mubr.msk.f32.vlgmr.msra.gmra.mrb[8].mxu0 %vm1770_vm7, %v1781_v53 }
 0xafe   : > { %3142 = vmatpush3.bf16.msra.mxu0 %v3141_v54  ;;  %3015 = vmatprep.mubr.msk.f32.mxu0 %vm3302_vm1, %v3303_v13 }
 0xaff   : > { %3143 = vmatprep.subr.bf16.mxu0 %v3301_v10 }
 0xb62   : > { %v1953_v55 = vpop.xlane.xlu1 %1952 }
 0xb63   : > { %3279 = vrcp.f32 %v1953_v55 }
 0xb66   : > { %v3235_v56 = vpop.permute.xlu1 %3234 }
 0xb67   : > { %v3237_v57 = vunpack.i.h.bf16 %v3235_v56  ;;  %v3236_v58 = vunpack.i.l.bf16 %v3235_v56 }
 0xb69   : > { %v3144_v61 = vpack.c.bf16 %v3237_v57, %v3236_v58  ;;  %v2809_v58 = vld [vmem:[%s3827_s14] ss:$0 sm:$0xff] }
 0xb6d   : > { %v3280_v59 = vpop.eup %3279 }
 0xb6e   : > { %v1955_v60 = vmul.f32 %v3280_v59, %v3276_v42 }
 0xb70   : > { %3016 = vmatmul.mubr.msk.f32.vlgmr.msra.gmra.mrb[10].mxu0 %vm1770_vm7, %v1955_v60 }
 0xb71   : > { %3146 = vmatpush3.bf16.xpose.msk.msra.mxu0 %vm3611_vm6, %v3144_v61  ;;  %3022 = vmatprep.mubr.msk.f32.mxu0 %vm3302_vm1, %v3303_v13 }
 0xb72   : > { %3154 = vmatprep.subr.bf16.mxu0 %v3301_v10 }
 0xb78   : > { %3023 = vmatmul.mubr.msk.f32.vlgmr.msra.gmra.mrb[12].mxu0 %vm732_vm2, %v2041_v62 }
 0xb79   : > { %3043 = vmatprep.mubr.msk.f32.mxu0 %vm3302_vm1, %v3303_v13 }
 0xbd0   : > { %v1857_v63 = vpop.f32.mrb[8].mxu0 }
 0xbd1   : > { %1861 = vst.msk [vmem:[#allocation2] sm:$0xff] %vm732_vm2, %v1857_v63  ;;  %v3003_v1 = vpop.f32.mrb[9].mxu0 }
 0xc43   : > { %v2031_v2 = vpop.f32.mrb[10].mxu0 }
 0xc44   : > { %v3017_v3 = vpop.f32.mrb[11].mxu0 }
 0xc4b   : > { %v2118_v4 = vpop.f32.mrb[12].mxu0 }
 0xc4c   : > { %v2122_v5 = vmul.f32 0.35355338, %v2118_v4  ;;  %v3024_v6 = vpop.f32.mrb[13].mxu0  ;;  %v2512_v4 = vld [vmem:[%s3828_s15] sm:$0xff] }
 0xc4d   : > { %v2514_v6 = vld [vmem:[%s3828_s15 + $0x10] sm:$0xff] }
 0xc4e   : > { %v2123_v7 = vsel %vm1770_vm7, %v2122_v5, -inf }
 0xc4f   : > { %2124 = vmax.xlane.f32.xlu1 %v2123_v7  ;;  %v2515_v7 = vld [vmem:[%s3828_s15 + $0x18] sm:$0xff] }
 0xc60   : > { %3244 = vrot.lane.b32.xlu1 %v3615_v17, %s3851_s25 }
 0xc64   : > { %2218 = vrot.lane.b32.xlu1 %v3622_v23, %s3851_s25  ;;  %s3856_s25 = smov 24  }
 0xcdc   : > { %v2125_v8 = vpop.xlane.xlu1 %2124 }
 0xcdd   : > { %v2126_v9 = vsub.f32 %v2122_v5, %v2125_v8  ;;  %v3167_v8 = vpack.c.bf16 %v2515_v7, %v2514_v6 }
 0xcdf   : > { %v2127_v11 = vmul.f32 1.442695, %v2126_v9  ;;  %v2601_v9 = vld [vmem:[%s3830_s17] sm:$0xff] }
 0xce0   : > { %v3245_v22 = vpop.permute.xlu1 %3244 }
 0xce1   : > { %3281 = vpow2.f32 %v2127_v11  ;;  %v3247_v24 = vunpack.i.h.bf16 %v3245_v22  ;;  %v3246_v25 = vunpack.i.l.bf16 %v3245_v22  ;;  %v2602_v11 = vld [vmem:[%s3830_s17 + $0x8] sm:$0xff] }
 0xce3   : > { %v3151_v27 = vpack.c.bf16 %v3247_v24, %v3246_v25 }
 0xce4   : > { %v2219_v28 = vpop.permute.xlu1 %2218 }
 0xceb   : > { %v3282_v12 = vpop.eup %3281 }
 0xcec   : > { %v2129_v14 = vsel %vm1770_vm7, %v3282_v12, 0.0 }
 0xced   : > { %2130 = vadd.xlane.f32.xlu0 %v2129_v14  ;;  %v3170_v14 = vpack.c.bf16 %v2602_v11, %v2601_v9 }
 0xd03   : > { %3239 = vrot.lane.b32.xlu0 %v3615_v17, %s3852_s3 }
 0xd7a   : > { %v2131_v15 = vpop.xlane.xlu0 %2130 }
 0xd7b   : > { %3283 = vrcp.f32 %v2131_v15  ;;  %v2604_v15 = vld [vmem:[%s3830_s17 + $0x18] sm:$0xff] }
 0xd7e   : > { %v3240_v18 = vpop.permute.xlu0 %3239 }
 0xd7f   : > { %v3242_v19 = vunpack.i.h.bf16 %v3240_v18  ;;  %v3241_v20 = vunpack.i.l.bf16 %v3240_v18 }
 0xd81   : > { %v3148_v21 = vpack.c.bf16 %v3242_v19, %v3241_v20  ;;  %v2605_v19 = vld [vmem:[%s3830_s17 + $0x20] sm:$0xff]  ;;  %v2606_v20 = vld [vmem:[%s3830_s17 + $0x28] sm:$0xff] }
 0xd83   : > { %3149 = vmatpush3.bf16.msra.mxu1 %v3148_v21  ;;  %v3176_v21 = vpack.c.bf16 %v2606_v20, %v2605_v19 }
 0xd84   : > { %3150 = vmatprep.subr.bf16.mxu1 %v3301_v10 }
 0xd85   : > { %v3284_v23 = vpop.eup %3283 }
 0xd86   : > { %v2133_v26 = vmul.f32 %v3284_v23, %v3282_v12  ;;  %v2603_v12 = vld [vmem:[%s3830_s17 + $0x10] sm:$0xff] }
 0xd87   : > { %v3173_v18 = vpack.c.bf16 %v2604_v15, %v2603_v12 }
 0xd88   : > { %3030 = vmatmul.mubr.msk.f32.vlgmr.msra.gmra.mrb[20].mxu1 %vm1770_vm7, %v2133_v26  ;;  %v2810_v26 = vld [vmem:[%s3819_s6] ss:$0 sm:$0xff] }
 0xd89   : > { %3036 = vmatprep.mubr.msk.f32.mxu1 %vm3302_vm1, %v3303_v13 }
 0xd8c   : > { %3153 = vmatpush3.bf16.xpose.msk.msra.mxu1 %vm3611_vm6, %v3151_v27 }
 0xd8d   : > { %3163 = vmatprep.subr.bf16.mxu1 %v3301_v10 }
 0xd93   : > { %3037 = vmatmul.mubr.msk.f32.vlgmr.msra.gmra.mrb[22].mxu1 %vm732_vm2, %v2219_v28  ;;  %v2811_v28 = vld [vmem:[%s3820_s7] ss:$0 sm:$0xff] }
 0xd94   : > { %3065 = vmatprep.mubr.msk.f32.mxu1 %vm3302_vm1, %v3303_v13 }
 0xe5b   : > { %v2209_v29 = vpop.f32.mrb[20].mxu1 }
 0xe5c   : > { %v3031_v30 = vpop.f32.mrb[21].mxu1 }
 0xe66   : > { %v2296_v31 = vpop.f32.mrb[22].mxu1 }
 0xe67   : > { %v2300_v32 = vmul.f32 0.35355338, %v2296_v31  ;;  %v3038_v33 = vpop.f32.mrb[23].mxu1  ;;  %v2607_v31 = vld [vmem:[%s3830_s17 + $0x30] sm:$0xff] }
 0xe69   : > { %v2301_v34 = vsel %vm1770_vm7, %v2300_v32, -inf }
 0xe6a   : > { %2302 = vmax.xlane.f32.xlu0 %v2301_v34  ;;  %v2609_v34 = vld [vmem:[%s3830_s17 + $0x40] sm:$0xff] }
 0xe80   : > { %3249 = vrot.lane.b32.xlu0 %v3615_v17, %s3853_s26  ;;  %s617_s26 = scalar_lea.vmem %s3832_s19, %s3857_s22 }
 0xe84   : > { %2214 = vrot.lane.b32.xlu0 %v2209_v29, %s3854_s28 }
 0xef7   : > { %v2303_v16 = vpop.xlane.xlu0 %2302 }
 0xef8   : > { %v2304_v35 = vsub.f32 %v2300_v32, %v2303_v16  ;;  %v2608_v32 = vld [vmem:[%s3830_s17 + $0x38] sm:$0xff]  ;;  %v2610_v16 = vld [vmem:[%s3830_s17 + $0x48] sm:$0xff] }
 0xef9   : > { %v3179_v33 = vpack.c.bf16 %v2608_v32, %v2607_v31 }
 0xefa   : > { %v2305_v36 = vmul.f32 1.442695, %v2304_v35  ;;  %v3182_v35 = vpack.c.bf16 %v2610_v16, %v2609_v34 }
 0xefb   : > { %v3250_v37 = vpop.permute.xlu0 %3249 }
 0xefc   : > { %3285 = vpow2.f32 %v2305_v36  ;;  %v3252_v38 = vunpack.i.h.bf16 %v3250_v37  ;;  %v3251_v39 = vunpack.i.l.bf16 %v3250_v37  ;;  %v2611_v36 = vld [vmem:[%s3830_s17 + $0x50] sm:$0xff]  ;;  %v2612_v37 = vld [vmem:[%s3830_s17 + $0x58] sm:$0xff] }
 0xefe   : > { %v3155_v40 = vpack.c.bf16 %v3252_v38, %v3251_v39  ;;  %v3185_v38 = vpack.c.bf16 %v2612_v37, %v2611_v36  ;;  %v2613_v39 = vld [vmem:[%s3830_s17 + $0x60] sm:$0xff] }
 0xeff   : > { %v2215_v44 = vpop.permute.xlu0 %2214 }
 0xf00   : > { %3156 = vmatpush3.bf16.msra.mxu0 %v3155_v40  ;;  %v2614_v40 = vld [vmem:[%s3830_s17 + $0x68] sm:$0xff] }
 0xf01   : > { %3157 = vmatprep.subr.bf16.mxu0 %v3301_v10 }
 0xf06   : > { %v3286_v41 = vpop.eup %3285 }
 0xf07   : > { %v2307_v42 = vsel %vm1770_vm7, %v3286_v41, 0.0 }
 0xf08   : > { %2308 = vadd.xlane.f32.xlu1 %v2307_v42  ;;  %v2615_v42 = vld [vmem:[%s3830_s17 + $0x70] sm:$0xff] }
 0xf19   : > { %2036 = vrot.lane.b32.xlu1 %v2031_v2, %s3855_s2 }
 0xf95   : > { %v2309_v17 = vpop.xlane.xlu1 %2308 }
 0xf96   : > { %3287 = vrcp.f32 %v2309_v17  ;;  %v2616_v17 = vld [vmem:[%s3830_s17 + $0x78] sm:$0xff] }
 0xf99   : > { %v2037_v43 = vpop.permute.xlu1 %2036 }
 0xf9a   : > { %2039 = vst.msk [vmem:[#allocation2] sm:$0xff] %vm1066_vm3, %v2037_v43  ;;  %v3191_v43 = vpack.c.bf16 %v2616_v17, %v2615_v42 }
 0xf9b   : > { %2217 = vst.msk [vmem:[#allocation2] sm:$0xff] %vm1238_vm4, %v2215_v44  ;;  %v2812_v44 = vld [vmem:[%s3829_s16] ss:$0 sm:$0xff] }
 0xfa0   : > { %v3288_v45 = vpop.eup %3287 }
 0xfa1   : > { %v2311_v47 = vmul.f32 %v3288_v45, %v3286_v41  ;;  %v3188_v41 = vpack.c.bf16 %v2614_v40, %v2613_v39 }
 0xfa3   : > { %3044 = vmatmul.mubr.msk.f32.vlgmr.msra.gmra.mrb[14].mxu0 %vm1770_vm7, %v2311_v47 }
 0xfa4   : > { %3054 = vmatprep.mubr.msk.f32.mxu0 %vm3302_vm1, %v3303_v13  ;;  %3159 = vmatpush3.bf16.msra.mxu0 %v3158_v50 }
 0xfa5   : > { %3160 = vmatprep.subr.bf16.mxu0 %v3301_v10 }
 0xfa8   : > { %3162 = vmatpush3.bf16.msra.mxu0 %v3161_v52  ;;  %v2814_v52 = vld [vmem:[%s3831_s18] ss:$0 sm:$0xff] }
 0xfa9   : > { %3169 = vmatprep.subr.bf16.mxu0 %v3301_v10 }
0x1076   : > { %v2387_v53 = vpop.f32.mrb[14].mxu0 }
0x1077   : > { %2392 = vrot.lane.b32.xlu1 %v2387_v53, %s3856_s25  ;;  %v3045_v54 = vpop.f32.mrb[15].mxu0 }
0x10e9   : > { %v2393_v55 = vpop.permute.xlu1 %2392 }
0x10ea   : > { %2395 = vst.msk [vmem:[#allocation2] sm:$0xff] %vm1410_vm5, %v2393_v55 }
0x10f1   : > { %v2396_v56 = vld [vmem:[#allocation2] sm:$0xff] }
0x10f2   : > { %3055 = vmatmul.mubr.msk.f32.vlgmr.msra.gmra.mrb[16].mxu0 %vm621_vm0, %v2396_v56 }
0x10f3   : > { %3100 = vmatprep.mubr.msk.f32.mxu0 %vm3302_vm1, %v3303_v13  ;;  %3171 = vmatpush3.bf16.msra.mxu0 %v3170_v14 }
0x10f4   : > { %3172 = vmatprep.subr.bf16.mxu0 %v3301_v10 }
0x10f7   : > { %3174 = vmatpush3.bf16.msra.mxu0 %v3173_v18 }
0x10f8   : > { %3175 = vmatprep.subr.bf16.mxu0 %v3301_v10 }
0x10fb   : > { %3177 = vmatpush3.bf16.msra.mxu0 %v3176_v21 }
0x10fc   : > { %3178 = vmatprep.subr.bf16.mxu0 %v3301_v10 }
0x10ff   : > { %3180 = vmatpush3.bf16.msra.mxu0 %v3179_v33 }
0x1100   : > { %3181 = vmatprep.subr.bf16.mxu0 %v3301_v10 }
0x1103   : > { %3183 = vmatpush3.bf16.msra.mxu0 %v3182_v35 }
0x1104   : > { %3184 = vmatprep.subr.bf16.mxu0 %v3301_v10 }
0x1107   : > { %3186 = vmatpush3.bf16.msra.mxu0 %v3185_v38 }
0x1108   : > { %3187 = vmatprep.subr.bf16.mxu0 %v3301_v10 }
0x110b   : > { %3189 = vmatpush3.bf16.msra.mxu0 %v3188_v41 }
0x110c   : > { %3190 = vmatprep.subr.bf16.mxu0 %v3301_v10 }
0x110f   : > { %3192 = vmatpush3.bf16.msra.mxu0 %v3191_v43 }
0x11c5   : > { %v2470_v57 = vpop.f32.mrb[16].mxu0 }
0x11c6   : > { %v2474_v59 = vadd.f32 %v2470_v57, %v3559_v46  ;;  %v3056_v60 = vpop.f32.mrb[17].mxu0  ;;  %v2513_v46 = vld [vmem:[%s3828_s15 + $0x8] sm:$0xff] }
0x11c7   : > { %v3164_v5 = vpack.c.bf16 %v2513_v46, %v2512_v4 }
0x11c8   : > { %v3716_v61 = vadd.f32 %v2809_v58, %v2474_v59 }
0x11c9   : > { %3165 = vmatpush3.bf16.msra.mxu1 %v3164_v5 }
0x11ca   : > { %v2483_v62 = vsel %vm621_vm0, %v3716_v61, 0.0  ;;  %3166 = vmatprep.subr.bf16.mxu1 %v3301_v10 }
0x11cb   : > { %2484 = vadd.xlane.f32.xlu0 %v2483_v62 }
0x11cd   : > { %3168 = vmatpush3.bf16.msra.mxu1 %v3167_v8 }
0x1258   : > { %v2485_v63 = vpop.xlane.xlu0 %2484 }
0x1259   : > { %v2486_v1 = vmul.f32 0.03125, %v2485_v63 }
0x125b   : > { %v2487_v2 = vsub.f32 %v3716_v61, %v2486_v1 }
0x125d   : > { %v2488_v3 = vmul.f32 %v2487_v2, %v2487_v2 }
0x125f   : > { %v2489_v13 = vsel %vm621_vm0, %v2488_v3, 0.0 }
0x1260   : > { %2490 = vadd.xlane.f32.xlu1 %v2489_v13 }
0x12ed   : > { %v2491_v22 = vpop.xlane.xlu1 %2490 }
0x12ee   : > { %v2492_v23 = vmul.f32 0.03125, %v2491_v22 }
0x12f0   : > { %v2493_v24 = vadd.f32 1e-05, %v2492_v23 }
0x12f2   : > { %3289 = vrsqrt.f32 %v2493_v24 }
0x12fc   : > { %v3290_v25 = vpop.eup %3289 }
0x12fd   : > { %v2495_v27 = vmul.f32 %v3290_v25, %v2487_v2 }
0x12ff   : > { %v2503_v29 = vmul.f32 %v2810_v26, %v2495_v27 }
0x1301   : > { %v2511_v30 = vadd.f32 %v2811_v28, %v2503_v29 }
0x1303   : > { %3066 = vmatmul.mubr.msk.f32.vlgmr.msra.gmra.mrb[24].mxu1 %vm621_vm0, %v2511_v30 }
0x13d6   : > { %v2592_v45 = vpop.f32.mrb[24].mxu1 }
0x13d7   : > { %v2593_v47 = vadd.f32 %v2812_v44, %v2592_v45  ;;  %v3067_v48 = vpop.f32.mrb[25].mxu1 }
0x13d9   : > { %v2597_v49 = vmul.f32 0.70710677, %v2593_v47  ;;  %v2596_v50 = vmul.f32 0.5, %v2593_v47 }
0x13db   : > { %3291 = verf.f32 %v2597_v49 }
0x13e5   : > { %v3292_v10 = vpop.eup %3291 }
0x13e6   : > { %v2599_v0 = vadd.f32 1.0, %v3292_v10 }
0x13e8   : > { %v2600_v51 = vmul.f32 %v2599_v0, %v2596_v50 }
0x13ea   : > { %3101 = vmatmul.mubr.f32.vlgmr.msra.gmra.mrb[18].mxu0 %v2600_v51 }
0x14bd   : > { %v2690_v53 = vpop.f32.mrb[18].mxu0 }
0x14be   : > { %v2691_v54 = vadd.f32 %v2814_v52, %v2690_v53  ;;  %v3102_v55 = vpop.f32.mrb[19].mxu0 }
0x14c0   : > { %v2694_v56 = vadd.f32 %v2691_v54, %v3716_v61 }
0x14c2   : > { %2695 = vst.msk [vmem:[%s617_s26] sm:$0xff] %vm621_vm0, %v2694_v56 }
0x14c3 PF: > { %s29_s0 = sadd.s32 1, %s3299_s0  }
0x14c4   : > { %p26_p4 = scmp.ge.s32.totalorder %s29_s0, 4  }
0x14c6   :  { %28 = sbr.rel (!%p26_p4) target bundleno = 5 (0x5), region = 129 }

</bundles_post_ra>
